<compile_context>
chip_gen: v7x
topology: tpu7x:2x2x1
jax: 0.10.0
libtpu: 0.0.40
codegen_flags: <defaults>
</compile_context>

<pallas_src>
import math
import functools

import jax
import jax.numpy as jnp
from jax.experimental import pallas as pl
from jax.experimental.pallas import tpu as pltpu


def _linear_attention_kernel(x_ref, g1_ref, wqkv_ref, wout_ref, bout_ref,
                             g2_ref, o_ref, *, heads, dim_head):
    # x_ref:    (C, N)         f32   one batch element, N = h*w (lane dim)
    # g1_ref:   (C, 1)         f32   first RMSNorm gain
    # wqkv_ref: (3*H*D, C)     f32   qkv 1x1-conv weight
    # wout_ref: (C, H*D)       f32   output 1x1-conv weight
    # bout_ref: (C, 1)         f32   output 1x1-conv bias
    # g2_ref:   (C, 1)         f32   second RMSNorm gain
    # o_ref:    (C, N)         f32
    C, N = x_ref.shape
    hd = heads * dim_head
    sqrt_c = float(C) ** 0.5
    scale = float(dim_head) ** -0.5
    eps = 1e-12  # F.normalize default

    x = x_ref[...]                                        # (C, N)

    # ---- RMSNorm #1: x / max(||x||_c, eps) * g * sqrt(C) ----
    g1s = g1_ref[...] * sqrt_c                            # fold sqrt(C) once, (C,1)
    ssq = jnp.sum(x * x, axis=0, keepdims=True)           # (1, N) sublane reduce
    inv = jax.lax.rsqrt(jnp.maximum(ssq, eps * eps))      # max(sqrt(ssq), eps)^-1
    xn = (x * inv) * g1s                                  # (C, N)

    # ---- qkv projection (1x1 conv == channel matmul on the MXU) ----
    qkv = jnp.dot(wqkv_ref[...], xn,
                  preferred_element_type=jnp.float32)     # (3*H*D, N)

    # ---- per-head linear attention, accumulate through output projection ----
    w_out = wout_ref[...]                                 # (C, H*D)
    acc = None
    for h in range(heads):                                # static unroll (heads small)
        lo = h * dim_head
        q = qkv[lo:lo + dim_head, :]                      # (D, N)
        k = qkv[hd + lo:hd + lo + dim_head, :]            # (D, N)
        v = qkv[2 * hd + lo:2 * hd + lo + dim_head, :]    # (D, N)

        # softmax over d (sublane axis)
        q = q - jnp.max(q, axis=0, keepdims=True)
        q = jnp.exp(q)
        q = q / jnp.sum(q, axis=0, keepdims=True)

        # softmax over n (lane axis)
        k = k - jnp.max(k, axis=1, keepdims=True)
        k = jnp.exp(k)
        k = k / jnp.sum(k, axis=1, keepdims=True)

        # context = k @ v^T  (D, D); fold the q-scale into this tiny tensor
        context = jnp.einsum('dn,en->de', k, v,
                             preferred_element_type=jnp.float32) * scale
        # out_h = context^T @ q  (D, N)
        out_h = jnp.einsum('de,dn->en', context, q,
                           preferred_element_type=jnp.float32)

        # fold head back through the output projection: y += W_out[:, head] @ out_h
        p = jnp.dot(w_out[:, lo:lo + dim_head], out_h,
                    preferred_element_type=jnp.float32)   # (C, N)
        acc = p if acc is None else acc + p

    y = acc + bout_ref[...]                               # (C, N) + (C, 1)

    # ---- RMSNorm #2 ----
    g2s = g2_ref[...] * sqrt_c
    ssq2 = jnp.sum(y * y, axis=0, keepdims=True)
    inv2 = jax.lax.rsqrt(jnp.maximum(ssq2, eps * eps))
    o_ref[...] = (y * inv2) * g2s


def linear_attention(x, g1, w_qkv, w_out, b_out, g2, *, heads=4, dim_head=32):
    """x: (B, C, H, W); 1x1-conv weights w_qkv (3*heads*dim_head, C),
    w_out (C, heads*dim_head), b_out (C,); RMSNorm gains g1, g2 (C,)."""
    B, C, H, W = x.shape
    N = H * W
    hd = heads * dim_head

    x3 = x.reshape(B, C, N).astype(jnp.float32)
    g1c = g1.reshape(C, 1).astype(jnp.float32)
    g2c = g2.reshape(C, 1).astype(jnp.float32)
    wqkv2 = w_qkv.reshape(3 * hd, C).astype(jnp.float32)
    wout2 = w_out.reshape(C, hd).astype(jnp.float32)
    bout2 = b_out.reshape(C, 1).astype(jnp.float32)

    kernel = functools.partial(_linear_attention_kernel,
                               heads=heads, dim_head=dim_head)

    out = pl.pallas_call(
        kernel,
        out_shape=jax.ShapeDtypeStruct((B, C, N), jnp.float32),
        grid=(B,),
        in_specs=[
            pl.BlockSpec((None, C, N), lambda b: (b, 0, 0)),   # x: one batch / step
            pl.BlockSpec((C, 1), lambda b: (0, 0)),            # g1
            pl.BlockSpec((3 * hd, C), lambda b: (0, 0)),        # w_qkv
            pl.BlockSpec((C, hd), lambda b: (0, 0)),            # w_out
            pl.BlockSpec((C, 1), lambda b: (0, 0)),             # b_out
            pl.BlockSpec((C, 1), lambda b: (0, 0)),             # g2
        ],
        out_specs=pl.BlockSpec((None, C, N), lambda b: (b, 0, 0)),
        compiler_params=pltpu.CompilerParams(
            dimension_semantics=("parallel",),   # shard batch over 2 TCs on v7x
        ),
    )(x3, g1c, wqkv2, wout2, bout2, g2c)

    return out.reshape(B, C, H, W)


def _reference(x, g1, w_qkv, w_out, b_out, g2, heads, dim_head):
    """Pure-JAX reference mirroring the PyTorch forward."""
    B, C, H, W = x.shape
    N = H * W
    eps = 1e-12
    hp = jax.lax.Precision.HIGHEST
    hd = heads * dim_head

    xr = x.reshape(B, C, N)
    nrm = jnp.sqrt(jnp.sum(xr * xr, axis=1, keepdims=True))
    xn = xr / jnp.maximum(nrm, eps) * g1.reshape(1, C, 1) * math.sqrt(C)

    qkv = jnp.einsum('oc,bcn->bon', w_qkv, xn, precision=hp)
    q = qkv[:, :hd].reshape(B, heads, dim_head, N)
    k = qkv[:, hd:2 * hd].reshape(B, heads, dim_head, N)
    v = qkv[:, 2 * hd:].reshape(B, heads, dim_head, N)

    q = jax.nn.softmax(q, axis=-2) * dim_head ** -0.5
    k = jax.nn.softmax(k, axis=-1)

    ctx = jnp.einsum('bhdn,bhen->bhde', k, v, precision=hp)
    o = jnp.einsum('bhde,bhdn->bhen', ctx, q, precision=hp)
    o = o.reshape(B, hd, N)

    y = jnp.einsum('co,bon->bcn', w_out, o, precision=hp) + b_out.reshape(1, C, 1)
    nrm2 = jnp.sqrt(jnp.sum(y * y, axis=1, keepdims=True))
    y = y / jnp.maximum(nrm2, eps) * g2.reshape(1, C, 1) * math.sqrt(C)
    return y.reshape(B, C, H, W)


if __name__ == "__main__":
    B, C, H, W = 2, 32, 16, 16       # small but TPU-friendly (N = 256 lanes)
    heads, dim_head = 4, 32
    hd = heads * dim_head

    key = jax.random.PRNGKey(0)
    kx, kq, ko, kb, kg1, kg2 = jax.random.split(key, 6)

    x = jax.random.normal(kx, (B, C, H, W), dtype=jnp.float32)
    w_qkv = jax.random.normal(kq, (3 * hd, C), dtype=jnp.float32) / math.sqrt(C)
    w_out = jax.random.normal(ko, (C, hd), dtype=jnp.float32) / math.sqrt(hd)
    b_out = 0.1 * jax.random.normal(kb, (C,), dtype=jnp.float32)
    # RMSNorm gains (torch init is ones; perturb to exercise the gain path)
    g1 = 1.0 + 0.1 * jax.random.normal(kg1, (C,), dtype=jnp.float32)
    g2 = 1.0 + 0.1 * jax.random.normal(kg2, (C,), dtype=jnp.float32)

    out = linear_attention(x, g1, w_qkv, w_out, b_out, g2,
                           heads=heads, dim_head=dim_head)
    out = jax.block_until_ready(out)

    ref = _reference(x, g1, w_qkv, w_out, b_out, g2, heads, dim_head)

    assert out.shape == (B, C, H, W), out.shape
    assert jnp.allclose(out, ref, atol=1e-3, rtol=1e-3), (
        "mismatch vs reference: max abs err "
        f"{float(jnp.max(jnp.abs(out - ref)))}"
    )

    print("KERNEL_OK")
</pallas_src>

<mosaic_0001>
module attributes {stable_mosaic.version = 11 : i64} {
  func.func @_linear_attention_kernel(%arg0: i32, %arg1: memref<1x32x256xf32, #tpu.memory_space<vmem>>, %arg2: memref<32x1xf32, #tpu.memory_space<vmem>>, %arg3: memref<384x32xf32, #tpu.memory_space<vmem>>, %arg4: memref<32x128xf32, #tpu.memory_space<vmem>>, %arg5: memref<32x1xf32, #tpu.memory_space<vmem>>, %arg6: memref<32x1xf32, #tpu.memory_space<vmem>>, %arg7: memref<1x32x256xf32, #tpu.memory_space<vmem>>) attributes {dimension_semantics = [#tpu.dimension_semantics<parallel>], iteration_bounds = array<i64: 2>, scalar_prefetch = 0 : i64, scratch_operands = 0 : i64, tpu.core_type = #tpu.core_type<tc>, window_params = [{transform_indices = @transform_0, window_bounds = array<i64: 1, 32, 256>}, {pipeline_mode = #tpu.pipeline_mode<synchronous>, transform_indices = @transform_1, window_bounds = array<i64: 32, 1>}, {pipeline_mode = #tpu.pipeline_mode<synchronous>, transform_indices = @transform_2, window_bounds = array<i64: 384, 32>}, {pipeline_mode = #tpu.pipeline_mode<synchronous>, transform_indices = @transform_3, window_bounds = array<i64: 32, 128>}, {pipeline_mode = #tpu.pipeline_mode<synchronous>, transform_indices = @transform_4, window_bounds = array<i64: 32, 1>}, {pipeline_mode = #tpu.pipeline_mode<synchronous>, transform_indices = @transform_5, window_bounds = array<i64: 32, 1>}, {transform_indices = @transform_6, window_bounds = array<i64: 1, 32, 256>}]} {
    %c0 = arith.constant 0 : index
    %c0_0 = arith.constant 0 : index
    %c0_1 = arith.constant 0 : index
    %0 = vector.load %arg1[%c0, %c0_0, %c0_1] : memref<1x32x256xf32, #tpu.memory_space<vmem>>, vector<1x32x256xf32>
    %1 = vector.shape_cast %0 : vector<1x32x256xf32> to vector<32x256xf32>
    %c0_2 = arith.constant 0 : index
    %c0_3 = arith.constant 0 : index
    %2 = vector.load %arg2[%c0_2, %c0_3] : memref<32x1xf32, #tpu.memory_space<vmem>>, vector<32x1xf32>
    %cst = arith.constant 5.65685415 : f32
    %3 = vector.broadcast %cst : f32 to vector<32x1xf32>
    %4 = arith.mulf %2, %3 : vector<32x1xf32>
    %5 = arith.mulf %1, %1 : vector<32x256xf32>
    %cst_4 = arith.constant dense<0.000000e+00> : vector<256xf32>
    %6 = vector.multi_reduction <add>, %5, %cst_4 [0] : vector<32x256xf32> to vector<256xf32>
    %7 = vector.shape_cast %6 : vector<256xf32> to vector<1x256xf32>
    %cst_5 = arith.constant 1.000000e-24 : f32
    %8 = vector.broadcast %cst_5 : f32 to vector<1x256xf32>
    %9 = arith.maximumf %7, %8 : vector<1x256xf32>
    %10 = math.rsqrt %9 : vector<1x256xf32>
    %11 = vector.broadcast %10 : vector<1x256xf32> to vector<32x256xf32>
    %12 = arith.mulf %1, %11 : vector<32x256xf32>
    %13 = vector.broadcast %4 : vector<32x1xf32> to vector<32x256xf32>
    %14 = arith.mulf %12, %13 : vector<32x256xf32>
    %c0_6 = arith.constant 0 : index
    %c0_7 = arith.constant 0 : index
    %15 = vector.load %arg3[%c0_6, %c0_7] : memref<384x32xf32, #tpu.memory_space<vmem>>, vector<384x32xf32>
    %cst_8 = arith.constant dense<0.000000e+00> : vector<384x256xf32>
    %16 = tpu.matmul %15, %14, %cst_8 {dimension_numbers = #tpu.dot_dimension_numbers<[1], [0], [0], [1], [0, 0, 1, 1], [], []>} : vector<384x32xf32>, vector<32x256xf32>, vector<384x256xf32> -> vector<384x256xf32>
    %c0_9 = arith.constant 0 : index
    %c0_10 = arith.constant 0 : index
    %17 = vector.load %arg4[%c0_9, %c0_10] : memref<32x128xf32, #tpu.memory_space<vmem>>, vector<32x128xf32>
    %18 = vector.extract_strided_slice %16 {offsets = [0, 0], sizes = [32, 256], strides = [1, 1]} : vector<384x256xf32> to vector<32x256xf32>
    %19 = vector.extract_strided_slice %16 {offsets = [128, 0], sizes = [32, 256], strides = [1, 1]} : vector<384x256xf32> to vector<32x256xf32>
    %20 = vector.extract_strided_slice %16 {offsets = [256, 0], sizes = [32, 256], strides = [1, 1]} : vector<384x256xf32> to vector<32x256xf32>
    %cst_11 = arith.constant dense<0xFF800000> : vector<256xf32>
    %21 = vector.multi_reduction <maximumf>, %18, %cst_11 [0] : vector<32x256xf32> to vector<256xf32>
    %22 = vector.shape_cast %21 : vector<256xf32> to vector<1x256xf32>
    %23 = vector.broadcast %22 : vector<1x256xf32> to vector<32x256xf32>
    %24 = arith.subf %18, %23 : vector<32x256xf32>
    %25 = math.exp %24 : vector<32x256xf32>
    %cst_12 = arith.constant dense<0.000000e+00> : vector<256xf32>
    %26 = vector.multi_reduction <add>, %25, %cst_12 [0] : vector<32x256xf32> to vector<256xf32>
    %27 = vector.shape_cast %26 : vector<256xf32> to vector<1x256xf32>
    %28 = vector.broadcast %27 : vector<1x256xf32> to vector<32x256xf32>
    %29 = arith.divf %25, %28 : vector<32x256xf32>
    %cst_13 = arith.constant dense<0xFF800000> : vector<32xf32>
    %30 = vector.multi_reduction <maximumf>, %19, %cst_13 [1] : vector<32x256xf32> to vector<32xf32>
    %31 = vector.shape_cast %30 : vector<32xf32> to vector<32x1xf32>
    %32 = vector.broadcast %31 : vector<32x1xf32> to vector<32x256xf32>
    %33 = arith.subf %19, %32 : vector<32x256xf32>
    %34 = math.exp %33 : vector<32x256xf32>
    %cst_14 = arith.constant dense<0.000000e+00> : vector<32xf32>
    %35 = vector.multi_reduction <add>, %34, %cst_14 [1] : vector<32x256xf32> to vector<32xf32>
    %36 = vector.shape_cast %35 : vector<32xf32> to vector<32x1xf32>
    %37 = vector.broadcast %36 : vector<32x1xf32> to vector<32x256xf32>
    %38 = arith.divf %34, %37 : vector<32x256xf32>
    "tpu.trace_start"() <{level = 10 : i32, message = "dn,en->de"}> : () -> ()
    %cst_15 = arith.constant dense<0.000000e+00> : vector<32x32xf32>
    %39 = tpu.matmul %38, %20, %cst_15 {dimension_numbers = #tpu.dot_dimension_numbers<[1], [1], [0], [0], [0, 0, 1, 0], [], []>} : vector<32x256xf32>, vector<32x256xf32>, vector<32x32xf32> -> vector<32x32xf32>
    "tpu.trace_stop"() : () -> ()
    %cst_16 = arith.constant 0.176776692 : f32
    %40 = vector.broadcast %cst_16 : f32 to vector<32x32xf32>
    %41 = arith.mulf %39, %40 : vector<32x32xf32>
    "tpu.trace_start"() <{level = 10 : i32, message = "de,dn->en"}> : () -> ()
    %cst_17 = arith.constant dense<0.000000e+00> : vector<32x256xf32>
    %42 = tpu.matmul %41, %29, %cst_17 {dimension_numbers = #tpu.dot_dimension_numbers<[0], [0], [1], [1], [0, 1, 1, 1], [], []>} : vector<32x32xf32>, vector<32x256xf32>, vector<32x256xf32> -> vector<32x256xf32>
    "tpu.trace_stop"() : () -> ()
    %43 = vector.extract_strided_slice %17 {offsets = [0, 0], sizes = [32, 32], strides = [1, 1]} : vector<32x128xf32> to vector<32x32xf32>
    %cst_18 = arith.constant dense<0.000000e+00> : vector<32x256xf32>
    %44 = tpu.matmul %43, %42, %cst_18 {dimension_numbers = #tpu.dot_dimension_numbers<[1], [0], [0], [1], [0, 0, 1, 1], [], []>} : vector<32x32xf32>, vector<32x256xf32>, vector<32x256xf32> -> vector<32x256xf32>
    %45 = vector.extract_strided_slice %16 {offsets = [32, 0], sizes = [32, 256], strides = [1, 1]} : vector<384x256xf32> to vector<32x256xf32>
    %46 = vector.extract_strided_slice %16 {offsets = [160, 0], sizes = [32, 256], strides = [1, 1]} : vector<384x256xf32> to vector<32x256xf32>
    %47 = vector.extract_strided_slice %16 {offsets = [288, 0], sizes = [32, 256], strides = [1, 1]} : vector<384x256xf32> to vector<32x256xf32>
    %cst_19 = arith.constant dense<0xFF800000> : vector<256xf32>
    %48 = vector.multi_reduction <maximumf>, %45, %cst_19 [0] : vector<32x256xf32> to vector<256xf32>
    %49 = vector.shape_cast %48 : vector<256xf32> to vector<1x256xf32>
    %50 = vector.broadcast %49 : vector<1x256xf32> to vector<32x256xf32>
    %51 = arith.subf %45, %50 : vector<32x256xf32>
    %52 = math.exp %51 : vector<32x256xf32>
    %cst_20 = arith.constant dense<0.000000e+00> : vector<256xf32>
    %53 = vector.multi_reduction <add>, %52, %cst_20 [0] : vector<32x256xf32> to vector<256xf32>
    %54 = vector.shape_cast %53 : vector<256xf32> to vector<1x256xf32>
    %55 = vector.broadcast %54 : vector<1x256xf32> to vector<32x256xf32>
    %56 = arith.divf %52, %55 : vector<32x256xf32>
    %cst_21 = arith.constant dense<0xFF800000> : vector<32xf32>
    %57 = vector.multi_reduction <maximumf>, %46, %cst_21 [1] : vector<32x256xf32> to vector<32xf32>
    %58 = vector.shape_cast %57 : vector<32xf32> to vector<32x1xf32>
    %59 = vector.broadcast %58 : vector<32x1xf32> to vector<32x256xf32>
    %60 = arith.subf %46, %59 : vector<32x256xf32>
    %61 = math.exp %60 : vector<32x256xf32>
    %cst_22 = arith.constant dense<0.000000e+00> : vector<32xf32>
    %62 = vector.multi_reduction <add>, %61, %cst_22 [1] : vector<32x256xf32> to vector<32xf32>
    %63 = vector.shape_cast %62 : vector<32xf32> to vector<32x1xf32>
    %64 = vector.broadcast %63 : vector<32x1xf32> to vector<32x256xf32>
    %65 = arith.divf %61, %64 : vector<32x256xf32>
    "tpu.trace_start"() <{level = 10 : i32, message = "dn,en->de"}> : () -> ()
    %cst_23 = arith.constant dense<0.000000e+00> : vector<32x32xf32>
    %66 = tpu.matmul %65, %47, %cst_23 {dimension_numbers = #tpu.dot_dimension_numbers<[1], [1], [0], [0], [0, 0, 1, 0], [], []>} : vector<32x256xf32>, vector<32x256xf32>, vector<32x32xf32> -> vector<32x32xf32>
    "tpu.trace_stop"() : () -> ()
    %cst_24 = arith.constant 0.176776692 : f32
    %67 = vector.broadcast %cst_24 : f32 to vector<32x32xf32>
    %68 = arith.mulf %66, %67 : vector<32x32xf32>
    "tpu.trace_start"() <{level = 10 : i32, message = "de,dn->en"}> : () -> ()
    %cst_25 = arith.constant dense<0.000000e+00> : vector<32x256xf32>
    %69 = tpu.matmul %68, %56, %cst_25 {dimension_numbers = #tpu.dot_dimension_numbers<[0], [0], [1], [1], [0, 1, 1, 1], [], []>} : vector<32x32xf32>, vector<32x256xf32>, vector<32x256xf32> -> vector<32x256xf32>
    "tpu.trace_stop"() : () -> ()
    %70 = vector.extract_strided_slice %17 {offsets = [0, 32], sizes = [32, 32], strides = [1, 1]} : vector<32x128xf32> to vector<32x32xf32>
    %cst_26 = arith.constant dense<0.000000e+00> : vector<32x256xf32>
    %71 = tpu.matmul %70, %69, %cst_26 {dimension_numbers = #tpu.dot_dimension_numbers<[1], [0], [0], [1], [0, 0, 1, 1], [], []>} : vector<32x32xf32>, vector<32x256xf32>, vector<32x256xf32> -> vector<32x256xf32>
    %72 = arith.addf %44, %71 : vector<32x256xf32>
    %73 = vector.extract_strided_slice %16 {offsets = [64, 0], sizes = [32, 256], strides = [1, 1]} : vector<384x256xf32> to vector<32x256xf32>
    %74 = vector.extract_strided_slice %16 {offsets = [192, 0], sizes = [32, 256], strides = [1, 1]} : vector<384x256xf32> to vector<32x256xf32>
    %75 = vector.extract_strided_slice %16 {offsets = [320, 0], sizes = [32, 256], strides = [1, 1]} : vector<384x256xf32> to vector<32x256xf32>
    %cst_27 = arith.constant dense<0xFF800000> : vector<256xf32>
    %76 = vector.multi_reduction <maximumf>, %73, %cst_27 [0] : vector<32x256xf32> to vector<256xf32>
    %77 = vector.shape_cast %76 : vector<256xf32> to vector<1x256xf32>
    %78 = vector.broadcast %77 : vector<1x256xf32> to vector<32x256xf32>
    %79 = arith.subf %73, %78 : vector<32x256xf32>
    %80 = math.exp %79 : vector<32x256xf32>
    %cst_28 = arith.constant dense<0.000000e+00> : vector<256xf32>
    %81 = vector.multi_reduction <add>, %80, %cst_28 [0] : vector<32x256xf32> to vector<256xf32>
    %82 = vector.shape_cast %81 : vector<256xf32> to vector<1x256xf32>
    %83 = vector.broadcast %82 : vector<1x256xf32> to vector<32x256xf32>
    %84 = arith.divf %80, %83 : vector<32x256xf32>
    %cst_29 = arith.constant dense<0xFF800000> : vector<32xf32>
    %85 = vector.multi_reduction <maximumf>, %74, %cst_29 [1] : vector<32x256xf32> to vector<32xf32>
    %86 = vector.shape_cast %85 : vector<32xf32> to vector<32x1xf32>
    %87 = vector.broadcast %86 : vector<32x1xf32> to vector<32x256xf32>
    %88 = arith.subf %74, %87 : vector<32x256xf32>
    %89 = math.exp %88 : vector<32x256xf32>
    %cst_30 = arith.constant dense<0.000000e+00> : vector<32xf32>
    %90 = vector.multi_reduction <add>, %89, %cst_30 [1] : vector<32x256xf32> to vector<32xf32>
    %91 = vector.shape_cast %90 : vector<32xf32> to vector<32x1xf32>
    %92 = vector.broadcast %91 : vector<32x1xf32> to vector<32x256xf32>
    %93 = arith.divf %89, %92 : vector<32x256xf32>
    "tpu.trace_start"() <{level = 10 : i32, message = "dn,en->de"}> : () -> ()
    %cst_31 = arith.constant dense<0.000000e+00> : vector<32x32xf32>
    %94 = tpu.matmul %93, %75, %cst_31 {dimension_numbers = #tpu.dot_dimension_numbers<[1], [1], [0], [0], [0, 0, 1, 0], [], []>} : vector<32x256xf32>, vector<32x256xf32>, vector<32x32xf32> -> vector<32x32xf32>
    "tpu.trace_stop"() : () -> ()
    %cst_32 = arith.constant 0.176776692 : f32
    %95 = vector.broadcast %cst_32 : f32 to vector<32x32xf32>
    %96 = arith.mulf %94, %95 : vector<32x32xf32>
    "tpu.trace_start"() <{level = 10 : i32, message = "de,dn->en"}> : () -> ()
    %cst_33 = arith.constant dense<0.000000e+00> : vector<32x256xf32>
    %97 = tpu.matmul %96, %84, %cst_33 {dimension_numbers = #tpu.dot_dimension_numbers<[0], [0], [1], [1], [0, 1, 1, 1], [], []>} : vector<32x32xf32>, vector<32x256xf32>, vector<32x256xf32> -> vector<32x256xf32>
    "tpu.trace_stop"() : () -> ()
    %98 = vector.extract_strided_slice %17 {offsets = [0, 64], sizes = [32, 32], strides = [1, 1]} : vector<32x128xf32> to vector<32x32xf32>
    %cst_34 = arith.constant dense<0.000000e+00> : vector<32x256xf32>
    %99 = tpu.matmul %98, %97, %cst_34 {dimension_numbers = #tpu.dot_dimension_numbers<[1], [0], [0], [1], [0, 0, 1, 1], [], []>} : vector<32x32xf32>, vector<32x256xf32>, vector<32x256xf32> -> vector<32x256xf32>
    %100 = arith.addf %72, %99 : vector<32x256xf32>
    %101 = vector.extract_strided_slice %16 {offsets = [96, 0], sizes = [32, 256], strides = [1, 1]} : vector<384x256xf32> to vector<32x256xf32>
    %102 = vector.extract_strided_slice %16 {offsets = [224, 0], sizes = [32, 256], strides = [1, 1]} : vector<384x256xf32> to vector<32x256xf32>
    %103 = vector.extract_strided_slice %16 {offsets = [352, 0], sizes = [32, 256], strides = [1, 1]} : vector<384x256xf32> to vector<32x256xf32>
    %cst_35 = arith.constant dense<0xFF800000> : vector<256xf32>
    %104 = vector.multi_reduction <maximumf>, %101, %cst_35 [0] : vector<32x256xf32> to vector<256xf32>
    %105 = vector.shape_cast %104 : vector<256xf32> to vector<1x256xf32>
    %106 = vector.broadcast %105 : vector<1x256xf32> to vector<32x256xf32>
    %107 = arith.subf %101, %106 : vector<32x256xf32>
    %108 = math.exp %107 : vector<32x256xf32>
    %cst_36 = arith.constant dense<0.000000e+00> : vector<256xf32>
    %109 = vector.multi_reduction <add>, %108, %cst_36 [0] : vector<32x256xf32> to vector<256xf32>
    %110 = vector.shape_cast %109 : vector<256xf32> to vector<1x256xf32>
    %111 = vector.broadcast %110 : vector<1x256xf32> to vector<32x256xf32>
    %112 = arith.divf %108, %111 : vector<32x256xf32>
    %cst_37 = arith.constant dense<0xFF800000> : vector<32xf32>
    %113 = vector.multi_reduction <maximumf>, %102, %cst_37 [1] : vector<32x256xf32> to vector<32xf32>
    %114 = vector.shape_cast %113 : vector<32xf32> to vector<32x1xf32>
    %115 = vector.broadcast %114 : vector<32x1xf32> to vector<32x256xf32>
    %116 = arith.subf %102, %115 : vector<32x256xf32>
    %117 = math.exp %116 : vector<32x256xf32>
    %cst_38 = arith.constant dense<0.000000e+00> : vector<32xf32>
    %118 = vector.multi_reduction <add>, %117, %cst_38 [1] : vector<32x256xf32> to vector<32xf32>
    %119 = vector.shape_cast %118 : vector<32xf32> to vector<32x1xf32>
    %120 = vector.broadcast %119 : vector<32x1xf32> to vector<32x256xf32>
    %121 = arith.divf %117, %120 : vector<32x256xf32>
    "tpu.trace_start"() <{level = 10 : i32, message = "dn,en->de"}> : () -> ()
    %cst_39 = arith.constant dense<0.000000e+00> : vector<32x32xf32>
    %122 = tpu.matmul %121, %103, %cst_39 {dimension_numbers = #tpu.dot_dimension_numbers<[1], [1], [0], [0], [0, 0, 1, 0], [], []>} : vector<32x256xf32>, vector<32x256xf32>, vector<32x32xf32> -> vector<32x32xf32>
    "tpu.trace_stop"() : () -> ()
    %cst_40 = arith.constant 0.176776692 : f32
    %123 = vector.broadcast %cst_40 : f32 to vector<32x32xf32>
    %124 = arith.mulf %122, %123 : vector<32x32xf32>
    "tpu.trace_start"() <{level = 10 : i32, message = "de,dn->en"}> : () -> ()
    %cst_41 = arith.constant dense<0.000000e+00> : vector<32x256xf32>
    %125 = tpu.matmul %124, %112, %cst_41 {dimension_numbers = #tpu.dot_dimension_numbers<[0], [0], [1], [1], [0, 1, 1, 1], [], []>} : vector<32x32xf32>, vector<32x256xf32>, vector<32x256xf32> -> vector<32x256xf32>
    "tpu.trace_stop"() : () -> ()
    %126 = vector.extract_strided_slice %17 {offsets = [0, 96], sizes = [32, 32], strides = [1, 1]} : vector<32x128xf32> to vector<32x32xf32>
    %cst_42 = arith.constant dense<0.000000e+00> : vector<32x256xf32>
    %127 = tpu.matmul %126, %125, %cst_42 {dimension_numbers = #tpu.dot_dimension_numbers<[1], [0], [0], [1], [0, 0, 1, 1], [], []>} : vector<32x32xf32>, vector<32x256xf32>, vector<32x256xf32> -> vector<32x256xf32>
    %128 = arith.addf %100, %127 : vector<32x256xf32>
    %c0_43 = arith.constant 0 : index
    %c0_44 = arith.constant 0 : index
    %129 = vector.load %arg5[%c0_43, %c0_44] : memref<32x1xf32, #tpu.memory_space<vmem>>, vector<32x1xf32>
    %130 = vector.broadcast %129 : vector<32x1xf32> to vector<32x256xf32>
    %131 = arith.addf %128, %130 : vector<32x256xf32>
    %c0_45 = arith.constant 0 : index
    %c0_46 = arith.constant 0 : index
    %132 = vector.load %arg6[%c0_45, %c0_46] : memref<32x1xf32, #tpu.memory_space<vmem>>, vector<32x1xf32>
    %cst_47 = arith.constant 5.65685415 : f32
    %133 = vector.broadcast %cst_47 : f32 to vector<32x1xf32>
    %134 = arith.mulf %132, %133 : vector<32x1xf32>
    %135 = arith.mulf %131, %131 : vector<32x256xf32>
    %cst_48 = arith.constant dense<0.000000e+00> : vector<256xf32>
    %136 = vector.multi_reduction <add>, %135, %cst_48 [0] : vector<32x256xf32> to vector<256xf32>
    %137 = vector.shape_cast %136 : vector<256xf32> to vector<1x256xf32>
    %cst_49 = arith.constant 1.000000e-24 : f32
    %138 = vector.broadcast %cst_49 : f32 to vector<1x256xf32>
    %139 = arith.maximumf %137, %138 : vector<1x256xf32>
    %140 = math.rsqrt %139 : vector<1x256xf32>
    %141 = vector.broadcast %140 : vector<1x256xf32> to vector<32x256xf32>
    %142 = arith.mulf %131, %141 : vector<32x256xf32>
    %143 = vector.broadcast %134 : vector<32x1xf32> to vector<32x256xf32>
    %144 = arith.mulf %142, %143 : vector<32x256xf32>
    %c0_50 = arith.constant 0 : index
    %c0_51 = arith.constant 0 : index
    %c0_52 = arith.constant 0 : index
    %145 = vector.load %arg7[%c0_50, %c0_51, %c0_52] : memref<1x32x256xf32, #tpu.memory_space<vmem>>, vector<1x32x256xf32>
    %146 = vector.shape_cast %145 : vector<1x32x256xf32> to vector<32x256xf32>
    %147 = vector.shape_cast %144 : vector<32x256xf32> to vector<1x32x256xf32>
    tpu.vector_store %arg7[%c0_50, %c0_51, %c0_52], %147 {strides = array<i32>} : memref<1x32x256xf32, #tpu.memory_space<vmem>>, vector<1x32x256xf32>,
    return
  }
  func.func @transform_0(%arg0: i32) -> (i32, i32, i32) {
    %c0_i32 = arith.constant 0 : i32
    %c0_i32_0 = arith.constant 0 : i32
    %c0_i32_1 = arith.constant 0 : i32
    return %arg0, %c0_i32, %c0_i32_0 : i32, i32, i32
  }
  func.func @transform_1(%arg0: i32) -> (i32, i32) {
    %c0_i32 = arith.constant 0 : i32
    %c0_i32_0 = arith.constant 0 : i32
    %c0_i32_1 = arith.constant 0 : i32
    return %c0_i32, %c0_i32_0 : i32, i32
  }
  func.func @transform_2(%arg0: i32) -> (i32, i32) {
    %c0_i32 = arith.constant 0 : i32
    %c0_i32_0 = arith.constant 0 : i32
    %c0_i32_1 = arith.constant 0 : i32
    return %c0_i32, %c0_i32_0 : i32, i32
  }
  func.func @transform_3(%arg0: i32) -> (i32, i32) {
    %c0_i32 = arith.constant 0 : i32
    %c0_i32_0 = arith.constant 0 : i32
    %c0_i32_1 = arith.constant 0 : i32
    return %c0_i32, %c0_i32_0 : i32, i32
  }
  func.func @transform_4(%arg0: i32) -> (i32, i32) {
    %c0_i32 = arith.constant 0 : i32
    %c0_i32_0 = arith.constant 0 : i32
    %c0_i32_1 = arith.constant 0 : i32
    return %c0_i32, %c0_i32_0 : i32, i32
  }
  func.func @transform_5(%arg0: i32) -> (i32, i32) {
    %c0_i32 = arith.constant 0 : i32
    %c0_i32_0 = arith.constant 0 : i32
    %c0_i32_1 = arith.constant 0 : i32
    return %c0_i32, %c0_i32_0 : i32, i32
  }
  func.func @transform_6(%arg0: i32) -> (i32, i32, i32) {
    %c0_i32 = arith.constant 0 : i32
    %c0_i32_0 = arith.constant 0 : i32
    %c0_i32_1 = arith.constant 0 : i32
    return %arg0, %c0_i32, %c0_i32_0 : i32, i32, i32
  }
}

</mosaic_0001>

<bundles_post_ra>
// kernel: tpu_custom_call.1
= control target key start
LH: loop header
LB: loop body
LE: loop exit
PB: predicated region body
PF: predicated region fallthrough
CT: control target
= control target key end

     0   :  { %11 = vsyncpa [#allocation3], 0  ;;  %s4729_s0 = inlined_call_operand.vmem [shape: f32[2,32,256], index: 0, kind: input, shape index: {}]   ;;  %s4730_s1 = inlined_call_operand.vmem [shape: f32[32,1], index: 1, kind: input, shape index: {}]   ;;  %s4731_s2 = inlined_call_operand.vmem [shape: f32[384,32], index: 2, kind: input, shape index: {}]   ;;  %s4732_s3 = inlined_call_operand.vmem [shape: f32[32,128], index: 3, kind: input, shape index: {}]   ;;  %s4733_s4 = inlined_call_operand.vmem [shape: f32[32,1], index: 4, kind: input, shape index: {}]   ;;  %s4734_s5 = inlined_call_operand.vmem [shape: f32[32,1], index: 5, kind: input, shape index: {}]   ;;  %s4735_s6 = inlined_call_operand.hbm [shape: f32[2,32,256], index: 6, kind: output, shape index: {}]  }
   0x1   :  { %13 = vsyncpa [#allocation3 + $0x1], 0  ;;  %s3477_s21 = smov 0   ;;  %s3479_s22 = smov 0  }
   0x2   :  { %s3481_s23 = smov 0   ;;  %s3483_s24 = smov 0  }
   0x3 LB: > { %s3498_s25 = sadd.s32 4294967295, %s3432_s24   ;;  %s2912_s26 = sadd.s32 4294967294, %s3432_s24   ;;  %s3432_s24 = sphi %s3483_s24, %s4842_s24   ;;  %s3428_s23 = sphi %s3481_s23, %s4841_s23   ;;  %s3424_s22 = sphi %s3479_s22, %s4840_s22   ;;  %s3420_s21 = sphi %s3477_s21, %s4839_s21  }
   0x4   : > { %s3502_s27 = sadd.s32 1, %s3432_s24   ;;  %s157_s28 = sadd.s32 1, %s3428_s23 }
   0x5   : > { %s154_s29 = ssub.s32 %s3432_s24, %s3502_s27  ;;  %p167_p0 = scmp.ne.s32.totalorder %s3428_s23, %s3424_s22 }
   0x6   : > { %p155_p1 = scmp.eq.s32.totalorder %s154_s29, 0  ;;  %p168_p2 = scmp.eq.s32.totalorder %s3498_s25, 1 }
   0x7   : > { %p173_p3 = scmp.ne.s32.totalorder %s3424_s22, %s3420_s21  ;;  %p174_p4 = scmp.eq.s32.totalorder %s2912_s26, 1 }
   0x8   : > { %s3513_s30 = scalar_select %p155_p1, %s3428_s23, %s157_s28  }
   0x9   : > { %p3515_p5 = por %p168_p2, %p167_p0  ;;  %p3519_p6 = por %p174_p4, %p173_p3 }
   0xa   : > { %p2915_p7 = scmp.ge.s32.totalorder %s3432_s24, 1  ;;  %p215_p8 = scmp.lt.s32.totalorder %s3432_s24, 3 }
   0xc   : > { %p216_p9 = pnand %p2915_p7, %p215_p8 }
   0xe   : > { %219 = sbr.rel (%p216_p9) target bundleno = 3180 (0xc6c), region = 44 }
  0x15   : > { %v260_v0 = vld [vmem:[%s4730_s1 + $0x10] sm:$0xff]  ;;  %v258_v1 = vld [vmem:[%s4730_s1] sm:$0xff]  ;;  %v261_v2 = vld [vmem:[%s4730_s1 + $0x18] sm:$0xff]  ;;  %v3434_v3 = vmov 0   ;;  %v4736_v9 = vmov 0.0   ;;  %p245_p10 = scmp.lt.s32.totalorder %s3498_s25, 1 }
  0x16   : > { %3185 = vset.pattern.permute.xlu1 %v3434_v3  ;;  %3184 = vset.pattern.permute.xlu0 %v3434_v3  ;;  %v264_v4 = vmul.f32 5.656854, %v260_v0  ;;  %v262_v5 = vmul.f32 5.656854, %v258_v1  ;;  %v259_v6 = vld [vmem:[%s4730_s1 + $0x8] sm:$0xff]  ;;  %vm380_vm0 = vcmask 261120  }
  0x17   : > { %v265_v7 = vmul.f32 5.656854, %v261_v2  ;;  %v263_v8 = vmul.f32 5.656854, %v259_v6  ;;  %589 = vmatprep.mubr.f32.mxu0 %v4736_v9  ;;  %s246_s17 = scalar_select %p245_p10, %s3498_s25, 1 }
  0x18   : > { %316 = vperm.xlu1 %3185, %v264_v4   ;;  %306 = vperm.xlu0 %3184, %v262_v5   ;;  %s3436_s15 = smov 96   ;;  %s3437_s28 = smov 64  }
  0x19   : > { %s3004_s18 = sshll.u32 %s246_s17, 6  ;;  %s3438_s29 = smov 32  }
  0x1a   : > { %s249_s26 = scalar_lea.vmem %s4729_s0, %s3004_s18  ;;  %s242_s10 = sand.u32 1, %s3424_s22  }
  0x1b   : > { %v250_v10 = vld [vmem:[%s249_s26] sm:$0xff]  ;;  %v252_v11 = vld [vmem:[%s249_s26 + $0x10] sm:$0xff]  ;;  %v251_v12 = vld [vmem:[%s249_s26 + $0x8] sm:$0xff]  ;;  %s2916_s11 = sshll.u32 %s242_s10, 6  ;;  %s3005_s12 = sshll.u32 %s3498_s25, 10 }
  0x1c   : > { %321 = vperm.xlu1 %3185, %v265_v7   ;;  %311 = vperm.xlu0 %3184, %v263_v8   ;;  %v253_v13 = vld [vmem:[%s249_s26 + $0x18] sm:$0xff]  ;;  %v266_v14 = vmul.f32 %v250_v10, %v250_v10  ;;  %v268_v15 = vmul.f32 %v252_v11, %v252_v11  ;;  %v254_v16 = vld [vmem:[%s249_s26 + $0x20] sm:$0xff]  ;;  %v267_v17 = vmul.f32 %v251_v12, %v251_v12  ;;  %v255_v19 = vld [vmem:[%s249_s26 + $0x28] sm:$0xff]  ;;  %s244_s13 = scalar_lea.vmem [#allocation2], %s2916_s11  ;;  %s4682_s16 = scalar_lea.hbm %s4735_s6, %s3005_s12 }
  0x1d   : > { %v269_v18 = vmul.f32 %v253_v13, %v253_v13  ;;  %v270_v20 = vmul.f32 %v254_v16, %v254_v16  ;;  %v256_v22 = vld [vmem:[%s249_s26 + $0x30] sm:$0xff]  ;;  %v271_v23 = vmul.f32 %v255_v19, %v255_v19  ;;  %v257_v25 = vld [vmem:[%s249_s26 + $0x38] sm:$0xff]  ;;  %v332_v8 = vld [vmem:[%s4731_s2] sm:$0xff]  ;;  %s2850_s14 = sshll.u32 %s244_s13, 4  ;;  %s4688_s17 = scalar_lea.sflag [#allocation3], %s242_s10  ;;  %s4684_s14 = int_to_ptr.vmem [resolvable:$true] %s2850_s14 }
  0x1e   : > { %v274_v21 = vadd.f32 %v268_v15, %v266_v14  ;;  %v272_v26 = vmul.f32 %v256_v22, %v256_v22  ;;  %v273_v28 = vmul.f32 %v257_v25, %v257_v25  ;;  %v337_v14 = vld [vmem:[%s4731_s2 + $0x28] sm:$0xff]  ;;  %v338_v15 = vld [vmem:[%s4731_s2 + $0x30] sm:$0xff]  ;;  %s3370_s18 = scalar_lea.vmem %s4684_s14, 1024  ;;  %s3439_s19 = smov [#allocation2]  }
  0x1f   : > { %v283_v24 = vadd.f32 %v269_v18, %v267_v17  ;;  %v340_v17 = vld [vmem:[%s4731_s2 + $0x40] sm:$0xff]  ;;  %v341_v18 = vld [vmem:[%s4731_s2 + $0x48] sm:$0xff]  ;;  %p3371_p11 = scmp.ne.s32.totalorder %s4684_s14, %s3370_s18  ;;  %s3374_s20 = sshll.u32 %s3439_s19, 4  ;;  %s3375_s20 = int_to_ptr.vmem [resolvable:$false] %s3374_s20 }
  0x20   : > { %v275_v27 = vadd.f32 %v274_v21, %v270_v20  ;;  %v343_v20 = vld [vmem:[%s4731_s2 + $0x58] sm:$0xff]  ;;  %v344_v21 = vld [vmem:[%s4731_s2 + $0x60] sm:$0xff]  ;;  %s3376_s26 = scalar_lea.vmem %s3375_s20, 2048  ;;  %p3377_p0 = scmp.lt.s32.totalorder %s4684_s14, %s3375_s20 }
  0x21   : > { %v284_v29 = vadd.f32 %v283_v24, %v271_v23  ;;  %v346_v23 = vld [vmem:[%s4731_s2 + $0x70] sm:$0xff]  ;;  %v347_v24 = vld [vmem:[%s4731_s2 + $0x78] sm:$0xff]  ;;  %p3372_p12 = pnand %p3371_p11, %p3515_p5  ;;  %p3378_p1 = scmp.lt.s32.totalorder %s3376_s26, %s3370_s18 }
  0x22   : > { %v276_v30 = vadd.f32 %v275_v27, %v272_v26  ;;  %v349_v26 = vld [vmem:[%s4731_s2 + $0x88] sm:$0xff]  ;;  %v350_v27 = vld [vmem:[%s4731_s2 + $0x90] sm:$0xff] }
  0x23   : > { %v285_v31 = vadd.f32 %v284_v29, %v273_v28  ;;  %v351_v28 = vld [vmem:[%s4731_s2 + $0x98] sm:$0xff]  ;;  %v352_v29 = vld [vmem:[%s4731_s2 + $0xa0] sm:$0xff]  ;;  %p3373_p13 = pneg %p3372_p12  ;;  %p3379_p2 = por %p3378_p1, %p3377_p0 }
  0x24   : > { %v277_v32 = vrot.slane %v276_v30, 4 }
  0x25   : > { %v286_v33 = vrot.slane %v285_v31, 4  ;;  %p3380_p3 = pnand %p3379_p2, %p3373_p13 }
  0x26   : > { %v278_v34 = vadd.f32 %v277_v32, %v276_v30  ;;  %v353_v30 = vld [vmem:[%s4731_s2 + $0xa8] sm:$0xff]  ;;  %v355_v32 = vld [vmem:[%s4731_s2 + $0xb8] sm:$0xff] }
  0x27   : > { %v287_v35 = vadd.f32 %v286_v33, %v285_v31  ;;  %v354_v31 = vld [vmem:[%s4731_s2 + $0xb0] sm:$0xff]  ;;  %v356_v33 = vld [vmem:[%s4731_s2 + $0xc0] sm:$0xff] }
  0x28   : > { %v279_v36 = vrot.slane %v278_v34, 2 }
  0x29   : > { %v288_v37 = vrot.slane %v287_v35, 2 }
  0x2a   : > { %v280_v38 = vadd.f32 %v279_v36, %v278_v34  ;;  %v357_v34 = vld [vmem:[%s4731_s2 + $0xc8] sm:$0xff]  ;;  %v359_v36 = vld [vmem:[%s4731_s2 + $0xd8] sm:$0xff] }
  0x2b   : > { %v289_v39 = vadd.f32 %v288_v37, %v287_v35  ;;  %v358_v35 = vld [vmem:[%s4731_s2 + $0xd0] sm:$0xff]  ;;  %v360_v37 = vld [vmem:[%s4731_s2 + $0xe0] sm:$0xff] }
  0x2c   : > { %v281_v40 = vrot.slane %v280_v38, 1 }
  0x2d   : > { %v290_v41 = vrot.slane %v289_v39, 1 }
  0x2e   : > { %v282_v42 = vadd.f32 %v281_v40, %v280_v38  ;;  %v361_v38 = vld [vmem:[%s4731_s2 + $0xe8] sm:$0xff]  ;;  %v363_v40 = vld [vmem:[%s4731_s2 + $0xf8] sm:$0xff] }
  0x2f   : > { %v291_v43 = vadd.f32 %v290_v41, %v289_v39  ;;  %v362_v39 = vld [vmem:[%s4731_s2 + $0xf0] sm:$0xff]  ;;  %v364_v41 = vld [vmem:[%s4731_s2 + $0x100] sm:$0xff] }
  0x30   : > { %v292_v44 = vmax.f32 %v282_v42, 1e-24  ;;  %v365_v42 = vld [vmem:[%s4731_s2 + $0x108] sm:$0xff] }
  0x31   : > { %v293_v45 = vmax.f32 %v291_v43, 1e-24  ;;  %v366_v43 = vld [vmem:[%s4731_s2 + $0x110] sm:$0xff] }
  0x32   : > { %3186 = vrsqrt.f32 %v292_v44  ;;  %v367_v44 = vld [vmem:[%s4731_s2 + $0x118] sm:$0xff] }
  0x33   : > { %3188 = vrsqrt.f32 %v293_v45 }
  0x3c   : > { %v3187_v46 = vpop.eup %3186 }
  0x3d   : > { %v3189_v47 = vpop.eup %3188  ;;  %v296_v51 = vmul.f32 %v3187_v46, %v250_v10  ;;  %v298_v54 = vmul.f32 %v3187_v46, %v252_v11  ;;  %v300_v56 = vmul.f32 %v3187_v46, %v254_v16  ;;  %v302_v60 = vmul.f32 %v3187_v46, %v256_v22  ;;  %v333_v10 = vld [vmem:[%s4731_s2 + $0x8] sm:$0xff]  ;;  %v334_v11 = vld [vmem:[%s4731_s2 + $0x10] sm:$0xff]  ;;  %v339_v16 = vld [vmem:[%s4731_s2 + $0x38] sm:$0xff] }
  0x3e   : > { %v301_v49 = vmul.f32 %v3189_v47, %v255_v19  ;;  %v297_v52 = vmul.f32 %v3189_v47, %v251_v12  ;;  %v303_v53 = vmul.f32 %v3189_v47, %v257_v25  ;;  %v299_v55 = vmul.f32 %v3189_v47, %v253_v13  ;;  %v335_v12 = vld [vmem:[%s4731_s2 + $0x18] sm:$0xff]  ;;  %v336_v13 = vld [vmem:[%s4731_s2 + $0x20] sm:$0xff]  ;;  %v342_v19 = vld [vmem:[%s4731_s2 + $0x50] sm:$0xff] }
  0x3f   : > { %v345_v22 = vld [vmem:[%s4731_s2 + $0x68] sm:$0xff]  ;;  %v348_v25 = vld [vmem:[%s4731_s2 + $0x80] sm:$0xff] }
  0x97   : > { %v317_v48 = vpop.permute.xlu1 %316  ;;  %v307_v50 = vpop.permute.xlu0 %306 }
  0x98   : > { %v329_v57 = vmul.f32 %v317_v48, %v301_v49  ;;  %v324_v58 = vmul.f32 %v307_v50, %v296_v51  ;;  %v325_v62 = vmul.f32 %v307_v50, %v297_v52  ;;  %v328_v4 = vmul.f32 %v317_v48, %v300_v56 }
  0x9b   : > { %v322_v59 = vpop.permute.xlu1 %321  ;;  %v312_v61 = vpop.permute.xlu0 %311 }
  0x9c   : > { %v331_v63 = vmul.f32 %v322_v59, %v303_v53  ;;  %v326_v0 = vmul.f32 %v312_v61, %v298_v54  ;;  %v327_v1 = vmul.f32 %v312_v61, %v299_v55  ;;  %v330_v5 = vmul.f32 %v322_v59, %v302_v60 }
  0x9e   : > { %v3006_v2 = vpack.c.bf16 %v327_v1, %v325_v62  ;;  %v3008_v3 = vpack.c.bf16 %v326_v0, %v324_v58  ;;  %v3010_v6 = vpack.c.bf16 %v331_v63, %v329_v57  ;;  %v3012_v7 = vpack.c.bf16 %v330_v5, %v328_v4 }
  0xa0   : > { %3007 = vmatprep.subr.bf16.mxu0 %v3006_v2 }
  0xa1   : > { %3009 = vmatpush1.bf16.msra.mxu0 %v3008_v3 }
  0xa2   : > { %3011 = vmatprep.subr.bf16.mxu0 %v3010_v6 }
  0xa5   : > { %3013 = vmatpush1.bf16.msra.mxu0 %v3012_v7 }
  0xa8   : > { %2919 = vmatmul.mubr.msk.f32.vlgmr.msra.gmra.mrb[0].mxu0 %vm380_vm0, %v332_v8 }
  0xa9   : > { %595 = vmatprep.mubr.f32.mxu0 %v4736_v9 }
  0xac   : > { %2920 = vmatmul.mubr.msk.f32.gmra.mrb[2].mxu0 %vm380_vm0, %v333_v10 }
  0xad   : > { %601 = vmatprep.mubr.f32.mxu0 %v4736_v9 }
  0xb0   : > { %2921 = vmatmul.mubr.msk.f32.gmra.mrb[4].mxu0 %vm380_vm0, %v334_v11 }
  0xb1   : > { %607 = vmatprep.mubr.f32.mxu0 %v4736_v9 }
  0xb4   : > { %2922 = vmatmul.mubr.msk.f32.gmra.mrb[6].mxu0 %vm380_vm0, %v335_v12 }
  0xb5   : > { %613 = vmatprep.mubr.f32.mxu0 %v4736_v9 }
  0xb8   : > { %2923 = vmatmul.mubr.msk.f32.gmra.mrb[8].mxu0 %vm380_vm0, %v336_v13 }
  0xb9   : > { %619 = vmatprep.mubr.f32.mxu0 %v4736_v9 }
  0xbc   : > { %2924 = vmatmul.mubr.msk.f32.gmra.mrb[10].mxu0 %vm380_vm0, %v337_v14 }
  0xbd   : > { %625 = vmatprep.mubr.f32.mxu0 %v4736_v9 }
  0xc0   : > { %2925 = vmatmul.mubr.msk.f32.gmra.mrb[12].mxu0 %vm380_vm0, %v338_v15 }
  0xc1   : > { %631 = vmatprep.mubr.f32.mxu0 %v4736_v9 }
  0xc4   : > { %2926 = vmatmul.mubr.msk.f32.gmra.mrb[14].mxu0 %vm380_vm0, %v339_v16 }
  0xc5   : > { %637 = vmatprep.mubr.f32.mxu0 %v4736_v9 }
  0xc8   : > { %2927 = vmatmul.mubr.msk.f32.gmra.mrb[16].mxu0 %vm380_vm0, %v340_v17 }
  0xc9   : > { %643 = vmatprep.mubr.f32.mxu0 %v4736_v9 }
  0xcc   : > { %2928 = vmatmul.mubr.msk.f32.gmra.mrb[18].mxu0 %vm380_vm0, %v341_v18 }
  0xcd   : > { %649 = vmatprep.mubr.f32.mxu0 %v4736_v9 }
  0xd0   : > { %2929 = vmatmul.mubr.msk.f32.gmra.mrb[20].mxu0 %vm380_vm0, %v342_v19 }
  0xd1   : > { %655 = vmatprep.mubr.f32.mxu0 %v4736_v9 }
  0xd4   : > { %2930 = vmatmul.mubr.msk.f32.gmra.mrb[22].mxu0 %vm380_vm0, %v343_v20 }
  0xd5   : > { %661 = vmatprep.mubr.f32.mxu0 %v4736_v9 }
  0xd8   : > { %2931 = vmatmul.mubr.msk.f32.gmra.mrb[24].mxu0 %vm380_vm0, %v344_v21 }
  0xd9   : > { %667 = vmatprep.mubr.f32.mxu0 %v4736_v9 }
  0xdc   : > { %2932 = vmatmul.mubr.msk.f32.gmra.mrb[26].mxu0 %vm380_vm0, %v345_v22 }
  0xdd   : > { %673 = vmatprep.mubr.f32.mxu0 %v4736_v9 }
  0xe0   : > { %2933 = vmatmul.mubr.msk.f32.gmra.mrb[28].mxu0 %vm380_vm0, %v346_v23 }
  0xe1   : > { %679 = vmatprep.mubr.f32.mxu0 %v4736_v9 }
  0xe4   : > { %2934 = vmatmul.mubr.msk.f32.gmra.mrb[30].mxu0 %vm380_vm0, %v347_v24 }
  0xe5   : > { %685 = vmatprep.mubr.f32.mxu0 %v4736_v9 }
  0xe8   : > { %2935 = vmatmul.mubr.msk.f32.gmra.mrb[32].mxu0 %vm380_vm0, %v348_v25 }
  0xe9   : > { %691 = vmatprep.mubr.f32.mxu0 %v4736_v9 }
  0xec   : > { %2936 = vmatmul.mubr.msk.f32.gmra.mrb[34].mxu0 %vm380_vm0, %v349_v26 }
  0xed   : > { %697 = vmatprep.mubr.f32.mxu0 %v4736_v9 }
  0xf0   : > { %2937 = vmatmul.mubr.msk.f32.gmra.mrb[36].mxu0 %vm380_vm0, %v350_v27 }
  0xf1   : > { %703 = vmatprep.mubr.f32.mxu0 %v4736_v9 }
  0xf4   : > { %2938 = vmatmul.mubr.msk.f32.gmra.mrb[38].mxu0 %vm380_vm0, %v351_v28 }
  0xf5   : > { %709 = vmatprep.mubr.f32.mxu0 %v4736_v9 }
  0xf8   : > { %2939 = vmatmul.mubr.msk.f32.gmra.mrb[40].mxu0 %vm380_vm0, %v352_v29 }
  0xf9   : > { %715 = vmatprep.mubr.f32.mxu0 %v4736_v9 }
  0xfc   : > { %2940 = vmatmul.mubr.msk.f32.gmra.mrb[42].mxu0 %vm380_vm0, %v353_v30 }
  0xfd   : > { %721 = vmatprep.mubr.f32.mxu0 %v4736_v9 }
 0x100   : > { %2941 = vmatmul.mubr.msk.f32.gmra.mrb[44].mxu0 %vm380_vm0, %v354_v31 }
 0x101   : > { %727 = vmatprep.mubr.f32.mxu0 %v4736_v9 }
 0x104   : > { %2942 = vmatmul.mubr.msk.f32.gmra.mrb[46].mxu0 %vm380_vm0, %v355_v32 }
 0x105   : > { %733 = vmatprep.mubr.f32.mxu0 %v4736_v9 }
 0x108   : > { %2943 = vmatmul.mubr.msk.f32.gmra.mrb[48].mxu0 %vm380_vm0, %v356_v33 }
 0x109   : > { %739 = vmatprep.mubr.f32.mxu0 %v4736_v9 }
 0x10c   : > { %2944 = vmatmul.mubr.msk.f32.gmra.mrb[50].mxu0 %vm380_vm0, %v357_v34 }
 0x10d   : > { %745 = vmatprep.mubr.f32.mxu0 %v4736_v9 }
 0x110   : > { %2945 = vmatmul.mubr.msk.f32.gmra.mrb[52].mxu0 %vm380_vm0, %v358_v35 }
 0x111   : > { %751 = vmatprep.mubr.f32.mxu0 %v4736_v9 }
 0x114   : > { %2946 = vmatmul.mubr.msk.f32.gmra.mrb[54].mxu0 %vm380_vm0, %v359_v36 }
 0x115   : > { %757 = vmatprep.mubr.f32.mxu0 %v4736_v9 }
 0x118   : > { %2947 = vmatmul.mubr.msk.f32.gmra.mrb[56].mxu0 %vm380_vm0, %v360_v37 }
 0x119   : > { %763 = vmatprep.mubr.f32.mxu0 %v4736_v9 }
 0x11c   : > { %2948 = vmatmul.mubr.msk.f32.gmra.mrb[58].mxu0 %vm380_vm0, %v361_v38 }
 0x11d   : > { %769 = vmatprep.mubr.f32.mxu0 %v4736_v9 }
 0x120   : > { %2949 = vmatmul.mubr.msk.f32.gmra.mrb[60].mxu0 %vm380_vm0, %v362_v39 }
 0x121   : > { %775 = vmatprep.mubr.f32.mxu0 %v4736_v9 }
 0x124   : > { %2950 = vmatmul.mubr.msk.f32.gmra.mrb[62].mxu0 %vm380_vm0, %v363_v40 }
 0x125   : > { %781 = vmatprep.mubr.f32.mxu0 %v4736_v9 }
 0x128   : > { %2951 = vmatmul.mubr.msk.f32.gmra.mrb[64].mxu0 %vm380_vm0, %v364_v41 }
 0x129   : > { %787 = vmatprep.mubr.f32.mxu0 %v4736_v9 }
 0x12c   : > { %2952 = vmatmul.mubr.msk.f32.gmra.mrb[66].mxu0 %vm380_vm0, %v365_v42 }
 0x12d   : > { %793 = vmatprep.mubr.f32.mxu0 %v4736_v9 }
 0x130   : > { %2953 = vmatmul.mubr.msk.f32.gmra.mrb[68].mxu0 %vm380_vm0, %v366_v43 }
 0x131   : > { %799 = vmatprep.mubr.f32.mxu0 %v4736_v9 }
 0x134   : > { %2954 = vmatmul.mubr.msk.f32.gmra.mrb[70].mxu0 %vm380_vm0, %v367_v44 }
 0x135   : > { %805 = vmatprep.mubr.f32.mxu0 %v4736_v9 }
 0x17b   : > { %v591_v45 = vpop.f32.mrb[0].mxu0 }
 0x17c   : > { %v593_v46 = vpop.f32.mrb[1].mxu0 }
 0x17f   : > { %v597_v47 = vpop.f32.mrb[2].mxu0 }
 0x180   : > { %v599_v48 = vpop.f32.mrb[3].mxu0 }
 0x183   : > { %v603_v49 = vpop.f32.mrb[4].mxu0 }
 0x184   : > { %v882_v50 = vmax.f32 %v591_v45, %v603_v49  ;;  %v605_v51 = vpop.f32.mrb[5].mxu0 }
 0x185   : > { %v891_v52 = vmax.f32 %v593_v46, %v605_v51 }
 0x187   : > { %v609_v53 = vpop.f32.mrb[6].mxu0 }
 0x188   : > { %v883_v54 = vmax.f32 %v597_v47, %v609_v53  ;;  %v611_v55 = vpop.f32.mrb[7].mxu0 }
 0x189   : > { %v892_v56 = vmax.f32 %v599_v48, %v611_v55 }
 0x18a   : > { %v884_v57 = vmax.f32 %v882_v50, %v883_v54 }
 0x18b   : > { %v893_v58 = vmax.f32 %v891_v52, %v892_v56  ;;  %v3723_v59 = vpop.f32.mrb[8].mxu0 }
 0x18c   : > { %v885_v60 = vrot.slane %v884_v57, 4  ;;  %v3725_v61 = vpop.f32.mrb[9].mxu0 }
 0x18d   : > { %v894_v62 = vrot.slane %v893_v58, 4 }
 0x18e   : > { %v886_v63 = vmax.f32 %v884_v57, %v885_v60 }
 0x18f   : > { %v895_v0 = vmax.f32 %v893_v58, %v894_v62  ;;  %v3727_v1 = vpop.f32.mrb[10].mxu0 }
 0x190   : > { %v887_v2 = vrot.slane %v886_v63, 2  ;;  %v3729_v3 = vpop.f32.mrb[11].mxu0 }
 0x191   : > { %v896_v4 = vrot.slane %v895_v0, 2 }
 0x192   : > { %v888_v5 = vmax.f32 %v886_v63, %v887_v2 }
 0x193   : > { %v897_v6 = vmax.f32 %v895_v0, %v896_v4  ;;  %v3731_v7 = vpop.f32.mrb[12].mxu0 }
 0x194   : > { %v889_v8 = vrot.slane %v888_v5, 1  ;;  %v1234_v10 = vmax.f32 %v3723_v59, %v3731_v7  ;;  %v3735_v11 = vpop.f32.mrb[13].mxu0 }
 0x195   : > { %v898_v12 = vrot.slane %v897_v6, 1  ;;  %v1243_v13 = vmax.f32 %v3725_v61, %v3735_v11 }
 0x196   : > { %v890_v14 = vmax.f32 %v888_v5, %v889_v8 }
 0x197   : > { %v899_v15 = vmax.f32 %v897_v6, %v898_v12  ;;  %v3739_v16 = vpop.f32.mrb[14].mxu0 }
 0x198   : > { %v900_v17 = vsub.f32 %v591_v45, %v890_v14  ;;  %v902_v18 = vsub.f32 %v597_v47, %v890_v14  ;;  %v904_v19 = vsub.f32 %v603_v49, %v890_v14  ;;  %v906_v20 = vsub.f32 %v609_v53, %v890_v14  ;;  %v3741_v21 = vpop.f32.mrb[15].mxu0 }
 0x199   : > { %v901_v22 = vsub.f32 %v593_v46, %v899_v15  ;;  %v903_v23 = vsub.f32 %v599_v48, %v899_v15  ;;  %v905_v24 = vsub.f32 %v605_v51, %v899_v15  ;;  %v907_v25 = vsub.f32 %v611_v55, %v899_v15 }
 0x19a   : > { %v908_v26 = vmul.f32 1.442695, %v900_v17  ;;  %v912_v27 = vmul.f32 1.442695, %v902_v18  ;;  %v916_v28 = vmul.f32 1.442695, %v904_v19  ;;  %v1235_v29 = vmax.f32 %v3727_v1, %v3739_v16 }
 0x19b   : > { %v920_v30 = vmul.f32 1.442695, %v906_v20  ;;  %v1244_v31 = vmax.f32 %v3729_v3, %v3741_v21  ;;  %v910_v32 = vmul.f32 1.442695, %v901_v22  ;;  %v3747_v34 = vpop.f32.mrb[16].mxu0 }
 0x19c   : > { %3190 = vpow2.f32 %v908_v26  ;;  %v1236_v33 = vmax.f32 %v1234_v10, %v1235_v29  ;;  %v914_v35 = vmul.f32 1.442695, %v903_v23  ;;  %v3749_v37 = vpop.f32.mrb[17].mxu0  ;;  %v918_v39 = vmul.f32 1.442695, %v905_v24 }
 0x19d   : > { %3192 = vpow2.f32 %v912_v27  ;;  %v1245_v36 = vmax.f32 %v1243_v13, %v1244_v31  ;;  %v922_v44 = vmul.f32 1.442695, %v907_v25 }
 0x19e   : > { %3194 = vpow2.f32 %v916_v28  ;;  %v1237_v38 = vrot.slane %v1236_v33, 4 }
 0x19f   : > { %3196 = vpow2.f32 %v920_v30  ;;  %v1246_v40 = vrot.slane %v1245_v36, 4  ;;  %v3751_v41 = vpop.f32.mrb[18].mxu0 }
 0x1a0   : > { %3198 = vpow2.f32 %v910_v32  ;;  %v1238_v42 = vmax.f32 %v1236_v33, %v1237_v38  ;;  %v3753_v43 = vpop.f32.mrb[19].mxu0 }
 0x1a1   : > { %3200 = vpow2.f32 %v914_v35  ;;  %v1247_v45 = vmax.f32 %v1245_v36, %v1246_v40 }
 0x1a2   : > { %v1239_v46 = vrot.slane %v1238_v42, 2  ;;  %3202 = vpow2.f32 %v918_v39 }
 0x1a3   : > { %v1248_v47 = vrot.slane %v1247_v45, 2  ;;  %v3755_v48 = vpop.f32.mrb[20].mxu0  ;;  %3204 = vpow2.f32 %v922_v44 }
 0x1a4   : > { %v1240_v49 = vmax.f32 %v1238_v42, %v1239_v46  ;;  %v1792_v50 = vmax.f32 %v3747_v34, %v3755_v48  ;;  %v3759_v51 = vpop.f32.mrb[21].mxu0 }
 0x1a5   : > { %v1249_v52 = vmax.f32 %v1247_v45, %v1248_v47  ;;  %v1801_v53 = vmax.f32 %v3749_v37, %v3759_v51 }
 0x1a6   : > { %v3763_v54 = vpop.eup %3190  ;;  %v1241_v55 = vrot.slane %v1240_v49, 1 }
 0x1a7   : > { %v3765_v56 = vpop.eup %3192  ;;  %v1250_v57 = vrot.slane %v1249_v52, 1  ;;  %v3767_v58 = vpop.f32.mrb[22].mxu0 }
 0x1a8   : > { %v3769_v60 = vpop.eup %3194  ;;  %v924_v62 = vadd.f32 %v3765_v56, %v3763_v54  ;;  %v1242_v63 = vmax.f32 %v1240_v49, %v1241_v55  ;;  %v1793_v0 = vmax.f32 %v3751_v41, %v3767_v58  ;;  %v3775_v2 = vpop.f32.mrb[23].mxu0 }
 0x1a9   : > { %v3777_v4 = vpop.eup %3196  ;;  %v1251_v5 = vmax.f32 %v1249_v52, %v1250_v57  ;;  %v1802_v6 = vmax.f32 %v3753_v43, %v3775_v2 }
 0x1aa   : > { %v3781_v8 = vpop.eup %3198  ;;  %v925_v10 = vadd.f32 %v3769_v60, %v924_v62  ;;  %v1252_v12 = vsub.f32 %v3723_v59, %v1242_v63  ;;  %v1254_v13 = vsub.f32 %v3727_v1, %v1242_v63  ;;  %v1256_v14 = vsub.f32 %v3731_v7, %v1242_v63 }
 0x1ab   : > { %v3787_v15 = vpop.eup %3200  ;;  %v1258_v17 = vsub.f32 %v3739_v16, %v1242_v63  ;;  %v1253_v18 = vsub.f32 %v3725_v61, %v1251_v5  ;;  %v1255_v19 = vsub.f32 %v3729_v3, %v1251_v5  ;;  %v1257_v20 = vsub.f32 %v3735_v11, %v1251_v5  ;;  %v3793_v22 = vpop.f32.mrb[24].mxu0 }
 0x1ac   : > { %v926_v23 = vadd.f32 %v3777_v4, %v925_v10  ;;  %v933_v59 = vadd.f32 %v3787_v15, %v3781_v8  ;;  %v1260_v1 = vmul.f32 1.442695, %v1252_v12  ;;  %v1264_v24 = vmul.f32 1.442695, %v1254_v13  ;;  %v3798_v7 = vpop.f32.mrb[25].mxu0  ;;  %v3800_v25 = vpop.eup %3202 }
 0x1ad   : > { %v1268_v16 = vmul.f32 1.442695, %v1256_v14  ;;  %v1272_v26 = vmul.f32 1.442695, %v1258_v17  ;;  %v1259_v61 = vsub.f32 %v3741_v21, %v1251_v5  ;;  %v1262_v27 = vmul.f32 1.442695, %v1253_v18  ;;  %v3804_v28 = vpop.eup %3204 }
 0x1ae   : > { %v927_v3 = vrot.slane %v926_v23, 4  ;;  %v934_v11 = vadd.f32 %v3800_v25, %v933_v59  ;;  %3206 = vpow2.f32 %v1260_v1  ;;  %v1266_v29 = vmul.f32 1.442695, %v1255_v19 }
 0x1af   : > { %3208 = vpow2.f32 %v1264_v24  ;;  %v1794_v30 = vmax.f32 %v1792_v50, %v1793_v0  ;;  %v3806_v31 = vpop.f32.mrb[26].mxu0  ;;  %v1803_v35 = vmax.f32 %v1801_v53, %v1802_v6  ;;  %v1270_v21 = vmul.f32 1.442695, %v1257_v20 }
 0x1b0   : > { %v928_v32 = vadd.f32 %v927_v3, %v926_v23  ;;  %v935_v33 = vadd.f32 %v3804_v28, %v934_v11  ;;  %3210 = vpow2.f32 %v1268_v16  ;;  %v3809_v36 = vpop.f32.mrb[27].mxu0  ;;  %v1274_v44 = vmul.f32 1.442695, %v1259_v61 }
 0x1b1   : > { %3212 = vpow2.f32 %v1272_v26  ;;  %v1795_v38 = vrot.slane %v1794_v30, 4  ;;  %v1804_v42 = vrot.slane %v1803_v35, 4 }
 0x1b2   : > { %v929_v39 = vrot.slane %v928_v32, 2  ;;  %v936_v40 = vrot.slane %v935_v33, 4  ;;  %3214 = vpow2.f32 %v1262_v27 }
 0x1b3   : > { %3216 = vpow2.f32 %v1266_v29  ;;  %v1796_v45 = vmax.f32 %v1794_v30, %v1795_v38  ;;  %v3811_v46 = vpop.f32.mrb[28].mxu0  ;;  %v1805_v50 = vmax.f32 %v1803_v35, %v1804_v42 }
 0x1b4   : > { %v930_v47 = vadd.f32 %v929_v39, %v928_v32  ;;  %v937_v49 = vadd.f32 %v936_v40, %v935_v33  ;;  %v3813_v52 = vpop.f32.mrb[29].mxu0  ;;  %3218 = vpow2.f32 %v1270_v21  ;;  %v2257_v55 = vmax.f32 %v3793_v22, %v3811_v46 }
 0x1b5   : > { %v1797_v53 = vrot.slane %v1796_v45, 2  ;;  %v2266_v57 = vmax.f32 %v3798_v7, %v3813_v52  ;;  %v1806_v0 = vrot.slane %v1805_v50, 2  ;;  %3220 = vpow2.f32 %v1274_v44 }
 0x1b6   : > { %v931_v62 = vrot.slane %v930_v47, 1  ;;  %v938_v63 = vrot.slane %v937_v49, 2 }
 0x1b7   : > { %v1798_v5 = vmax.f32 %v1796_v45, %v1797_v53  ;;  %v3819_v6 = vpop.f32.mrb[30].mxu0  ;;  %v1807_v14 = vmax.f32 %v1805_v50, %v1806_v0 }
 0x1b8   : > { %v3821_v10 = vpop.eup %3206  ;;  %v932_v12 = vadd.f32 %v931_v62, %v930_v47  ;;  %v939_v13 = vadd.f32 %v938_v63, %v937_v49  ;;  %v2258_v17 = vmax.f32 %v3806_v31, %v3819_v6  ;;  %v3825_v18 = vpop.f32.mrb[31].mxu0 }
 0x1b9   : > { %v3827_v19 = vpop.eup %3208  ;;  %v1799_v20 = vrot.slane %v1798_v5, 1  ;;  %v2267_v23 = vmax.f32 %v3809_v36, %v3825_v18  ;;  %v1808_v16 = vrot.slane %v1807_v14, 1 }
 0x1ba   : > { %v3831_v59 = vpop.eup %3210  ;;  %3222 = vrcp.f32 %v932_v12  ;;  %v940_v1 = vrot.slane %v939_v13, 1  ;;  %v1276_v24 = vadd.f32 %v3827_v19, %v3821_v10  ;;  %v2259_v3 = vmax.f32 %v2257_v55, %v2258_v17 }
 0x1bb   : > { %v3835_v26 = vpop.eup %3212  ;;  %v1800_v61 = vmax.f32 %v1798_v5, %v1799_v20  ;;  %v2268_v11 = vmax.f32 %v2266_v57, %v2267_v23  ;;  %v3837_v27 = vpop.f32.mrb[32].mxu0  ;;  %v1809_v33 = vmax.f32 %v1807_v14, %v1808_v16 }
 0x1bc   : > { %v3839_v29 = vpop.eup %3214  ;;  %v941_v30 = vadd.f32 %v940_v1, %v939_v13  ;;  %v1277_v32 = vadd.f32 %v3831_v59, %v1276_v24  ;;  %v3842_v35 = vpop.f32.mrb[33].mxu0  ;;  %v2260_v20 = vrot.slane %v2259_v3, 4 }
 0x1bd   : > { %v3844_v21 = vpop.eup %3216  ;;  %v1810_v38 = vsub.f32 %v3747_v34, %v1800_v61  ;;  %v1812_v39 = vsub.f32 %v3751_v41, %v1800_v61  ;;  %v1814_v40 = vsub.f32 %v3755_v48, %v1800_v61  ;;  %v1816_v42 = vsub.f32 %v3767_v58, %v1800_v61 }
 0x1be   : > { %3224 = vrcp.f32 %v941_v30  ;;  %v1278_v44 = vadd.f32 %v3835_v26, %v1277_v32  ;;  %v1285_v45 = vadd.f32 %v3844_v21, %v3839_v29  ;;  %v1811_v47 = vsub.f32 %v3749_v37, %v1809_v33  ;;  %v3854_v49 = vpop.eup %3218 }
 0x1bf   : > { %v1818_v50 = vmul.f32 1.442695, %v1810_v38  ;;  %v1822_v53 = vmul.f32 1.442695, %v1812_v39  ;;  %v1826_v55 = vmul.f32 1.442695, %v1814_v40  ;;  %v1813_v34 = vsub.f32 %v3753_v43, %v1809_v33  ;;  %v3861_v63 = vpop.eup %3220 }
 0x1c0   : > { %v1279_v41 = vrot.slane %v1278_v44, 4  ;;  %v1286_v48 = vadd.f32 %v3854_v49, %v1285_v45  ;;  %v1830_v57 = vmul.f32 1.442695, %v1816_v42  ;;  %v1815_v58 = vsub.f32 %v3759_v51, %v1809_v33  ;;  %v3859_v62 = vpop.f32.mrb[34].mxu0 }
 0x1c1   : > { %3226 = vpow2.f32 %v1818_v50  ;;  %v1817_v37 = vsub.f32 %v3775_v2, %v1809_v33  ;;  %v1820_v0 = vmul.f32 1.442695, %v1811_v47  ;;  %v1824_v5 = vmul.f32 1.442695, %v1813_v34  ;;  %v3864_v12 = vpop.f32.mrb[35].mxu0 }
 0x1c2   : > { %v1280_v13 = vadd.f32 %v1279_v41, %v1278_v44  ;;  %v1287_v43 = vadd.f32 %v3861_v63, %v1286_v48  ;;  %3228 = vpow2.f32 %v1822_v53  ;;  %v1828_v14 = vmul.f32 1.442695, %v1815_v58 }
 0x1c3   : > { %3230 = vpow2.f32 %v1826_v55  ;;  %v1832_v17 = vmul.f32 1.442695, %v1817_v37  ;;  %v2269_v51 = vrot.slane %v2268_v11, 4  ;;  %v3867_v23 = vpop.f32.mrb[36].mxu0  ;;  %v952_v2 = vmax.f32 %v3837_v27, %v3842_v35 }
 0x1c4   : > { %v3223_v1 = vpop.eup %3222  ;;  %v1281_v24 = vrot.slane %v1280_v13, 2  ;;  %v1288_v16 = vrot.slane %v1287_v43, 4  ;;  %3232 = vpow2.f32 %v1830_v57  ;;  %v3871_v61 = vpop.f32.mrb[37].mxu0  ;;  %v2261_v30 = vmax.f32 %v2259_v3, %v2260_v20 }
 0x1c5   : > { %3234 = vpow2.f32 %v1820_v0  ;;  %v2270_v32 = vmax.f32 %v2268_v11, %v2269_v51  ;;  %v955_v33 = vmax.f32 %v3859_v62, %v3864_v12  ;;  %953 = vmax.xlane.f32.xlu1 %v952_v2  ;;  %v958_v40 = vmax.f32 %v3867_v23, %v3871_v61 }
 0x1c6   : > { %v1282_v38 = vadd.f32 %v1281_v24, %v1280_v13  ;;  %v1289_v39 = vadd.f32 %v1288_v16, %v1287_v43  ;;  %3236 = vpow2.f32 %v1824_v5  ;;  %v2262_v42 = vrot.slane %v2261_v30, 2 }
 0x1c7   : > { %3238 = vpow2.f32 %v1828_v14  ;;  %v2271_v44 = vrot.slane %v2270_v32, 2  ;;  %956 = vmax.xlane.f32.xlu0 %v955_v33  ;;  %v3877_v45 = vpop.f32.mrb[38].mxu0  ;;  %v3880_v47 = vmul.f32 %v3223_v1, %v3763_v54  ;;  %v3885_v55 = vmul.f32 %v3223_v1, %v3765_v56 }
 0x1c8   : > { %v3225_v3 = vpop.eup %3224  ;;  %v1283_v11 = vrot.slane %v1282_v38, 1  ;;  %v1290_v50 = vrot.slane %v1289_v39, 2  ;;  %3240 = vpow2.f32 %v1832_v17  ;;  %v3882_v53 = vpop.f32.mrb[39].mxu0  ;;  %v2263_v34 = vmax.f32 %v2261_v30, %v2262_v42 }
 0x1c9   : > { %v2272_v41 = vmax.f32 %v2270_v32, %v2271_v44  ;;  %v961_v48 = vmax.f32 %v3877_v45, %v3882_v53  ;;  %v3890_v57 = vmul.f32 %v3225_v3, %v3781_v8  ;;  %v3893_v37 = vmul.f32 %v3225_v3, %v3787_v15 }
 0x1ca   : > { %v1284_v58 = vadd.f32 %v1283_v11, %v1282_v38  ;;  %v1291_v54 = vadd.f32 %v1290_v50, %v1289_v39  ;;  %v2264_v56 = vrot.slane %v2263_v34, 1  ;;  %v3902_v14 = vmul.f32 %v3225_v3, %v3800_v25 }
 0x1cb   : > { %v3897_v5 = vpop.eup %3226  ;;  %v2273_v13 = vrot.slane %v2272_v41, 1  ;;  %959 = vmax.xlane.f32.xlu0 %v958_v40  ;;  %v3899_v43 = vpop.f32.mrb[40].mxu0  ;;  %v3905_v8 = vmul.f32 %v3225_v3, %v3804_v28  ;;  %v3914_v24 = vmul.f32 %v3223_v1, %v3769_v60  ;;  %v3925_v38 = vmul.f32 %v3223_v1, %v3777_v4 }
 0x1cc   : > { %v3907_v17 = vpop.eup %3228  ;;  %3242 = vrcp.f32 %v1284_v58  ;;  %v1292_v15 = vrot.slane %v1291_v54, 1  ;;  %v3909_v20 = vpop.f32.mrb[41].mxu0  ;;  %v2265_v2 = vmax.f32 %v2263_v34, %v2264_v56 }
 0x1cd   : > { %v3916_v16 = vpop.eup %3230  ;;  %v1834_v25 = vadd.f32 %v3907_v17, %v3897_v5  ;;  %v2274_v28 = vmax.f32 %v2272_v41, %v2273_v13 }
 0x1ce   : > { %v3922_v32 = vpop.eup %3232  ;;  %v1293_v33 = vadd.f32 %v1292_v15, %v1291_v54  ;;  %v2275_v40 = vsub.f32 %v3793_v22, %v2265_v2  ;;  %v2277_v42 = vsub.f32 %v3806_v31, %v2265_v2  ;;  %v2279_v44 = vsub.f32 %v3811_v46, %v2265_v2 }
 0x1cf   : > { %v3927_v39 = vpop.eup %3234  ;;  %v1835_v60 = vadd.f32 %v3916_v16, %v1834_v25  ;;  %962 = vmax.xlane.f32.xlu0 %v961_v48  ;;  %v3933_v3 = vpop.f32.mrb[42].mxu0  ;;  %v2281_v50 = vsub.f32 %v3819_v6, %v2265_v2  ;;  %v2276_v4 = vsub.f32 %v3798_v7, %v2274_v28  ;;  %v2278_v1 = vsub.f32 %v3809_v36, %v2274_v28 }
 0x1d0   : > { %v3935_v11 = vpop.eup %3236  ;;  %3244 = vrcp.f32 %v1293_v33  ;;  %v3940_v34 = vpop.f32.mrb[43].mxu0  ;;  %v2283_v46 = vmul.f32 1.442695, %v2275_v40  ;;  %v2287_v48 = vmul.f32 1.442695, %v2277_v42  ;;  %v2280_v6 = vsub.f32 %v3813_v52, %v2274_v28 }
 0x1d1   : > { %v3942_v41 = vpop.eup %3238  ;;  %v1836_v22 = vadd.f32 %v3922_v32, %v1835_v60  ;;  %v1843_v31 = vadd.f32 %v3935_v11, %v3927_v39  ;;  %v2291_v54 = vmul.f32 1.442695, %v2279_v44  ;;  %v2295_v56 = vmul.f32 1.442695, %v2281_v50 }
 0x1d2   : > { %v3947_v58 = vpop.eup %3240  ;;  %v2282_v7 = vsub.f32 %v3825_v18, %v2274_v28  ;;  %3246 = vpow2.f32 %v2283_v46  ;;  %v2285_v15 = vmul.f32 1.442695, %v2276_v4  ;;  %v2289_v2 = vmul.f32 1.442695, %v2278_v1 }
 0x1d3   : > { %v1837_v36 = vrot.slane %v1836_v22, 4  ;;  %v1844_v13 = vadd.f32 %v3942_v41, %v1843_v31  ;;  %v3952_v25 = vpop.f32.mrb[44].mxu0  ;;  %3248 = vpow2.f32 %v2287_v48  ;;  %v2293_v18 = vmul.f32 1.442695, %v2280_v6 }
 0x1d4   : > { %3250 = vpow2.f32 %v2291_v54  ;;  %v3955_v40 = vpop.f32.mrb[45].mxu0  ;;  %v2297_v28 = vmul.f32 1.442695, %v2282_v7 }
 0x1d5   : > { %v1838_v33 = vadd.f32 %v1837_v36, %v1836_v22  ;;  %v1845_v60 = vadd.f32 %v3947_v58, %v1844_v13  ;;  %3252 = vpow2.f32 %v2295_v56 }
 0x1d6   : > { %v3243_v42 = vpop.eup %3242  ;;  %3254 = vpow2.f32 %v2285_v15 }
 0x1d7   : > { %v1839_v44 = vrot.slane %v1838_v33, 2  ;;  %v1846_v50 = vrot.slane %v1845_v60, 4  ;;  %v3959_v4 = vpop.f32.mrb[46].mxu0  ;;  %v3962_v1 = vmul.f32 %v3243_v42, %v3821_v10  ;;  %3256 = vpow2.f32 %v2289_v2 }
 0x1d8   : > { %v3964_v22 = vpop.f32.mrb[47].mxu0  ;;  %v3967_v31 = vmul.f32 %v3243_v42, %v3827_v19  ;;  %v3970_v46 = vmul.f32 %v3243_v42, %v3831_v59  ;;  %v3973_v48 = vmul.f32 %v3243_v42, %v3835_v26  ;;  %3258 = vpow2.f32 %v2293_v18 }
 0x1d9   : > { %4759 = vst [vmem:[#allocation5_spill] sm:$0xff] %v3962_v1  ;;  %v1840_v54 = vadd.f32 %v1839_v44, %v1838_v33  ;;  %v1847_v56 = vadd.f32 %v1846_v50, %v1845_v60  ;;  %3260 = vpow2.f32 %v2297_v28 }
 0x1da   : > { %4760 = vst [vmem:[#allocation6_spill] sm:$0xff] %v3967_v31  ;;  %4761 = vst [vmem:[#allocation7_spill] sm:$0xff] %v3970_v46  ;;  %v3245_v6 = vpop.eup %3244 }
 0x1db   : > { %4762 = vst [vmem:[#allocation8_spill] sm:$0xff] %v3973_v48  ;;  %v1841_v36 = vrot.slane %v1840_v54, 1  ;;  %v1848_v13 = vrot.slane %v1847_v56, 2  ;;  %v3979_v19 = vpop.f32.mrb[48].mxu0  ;;  %v3982_v59 = vmul.f32 %v3245_v6, %v3839_v29  ;;  %v3985_v26 = vmul.f32 %v3245_v6, %v3844_v21 }
 0x1dc   : > { %v3987_v15 = vpop.f32.mrb[49].mxu0  ;;  %v3990_v2 = vmul.f32 %v3245_v6, %v3854_v49  ;;  %v3993_v33 = vmul.f32 %v3245_v6, %v3861_v63  ;;  %v3995_v60 = vpop.eup %3246 }
 0x1dd   : > { %4763 = vst [vmem:[#allocation9_spill] sm:$0xff] %v3982_v59  ;;  %4764 = vst [vmem:[#allocation10_spill] sm:$0xff] %v3985_v26  ;;  %v1842_v42 = vadd.f32 %v1841_v36, %v1840_v54  ;;  %v1849_v18 = vadd.f32 %v1848_v13, %v1847_v56  ;;  %v3999_v44 = vpop.eup %3248 }
 0x1de   : > { %4765 = vst [vmem:[#allocation11_spill] sm:$0xff] %v3990_v2  ;;  %4766 = vst [vmem:[#allocation12_spill] sm:$0xff] %v3993_v33  ;;  %v4003_v28 = vpop.eup %3250  ;;  %v2299_v63 = vadd.f32 %v3999_v44, %v3995_v60 }
 0x1df   : > { %3262 = vrcp.f32 %v1842_v42  ;;  %v1850_v49 = vrot.slane %v1849_v18, 1  ;;  %v4007_v50 = vpop.f32.mrb[50].mxu0  ;;  %v4009_v6 = vpop.eup %3252 }
 0x1e0   : > { %v4011_v54 = vpop.f32.mrb[51].mxu0  ;;  %v4013_v56 = vpop.eup %3254  ;;  %v2300_v13 = vadd.f32 %v4003_v28, %v2299_v63 }
 0x1e1   : > { %v1851_v36 = vadd.f32 %v1850_v49, %v1849_v18  ;;  %v4016_v7 = vpop.eup %3256 }
 0x1e2   : > { %v2301_v42 = vadd.f32 %v4009_v6, %v2300_v13  ;;  %v2308_v21 = vadd.f32 %v4016_v7, %v4013_v56  ;;  %v4023_v29 = vpop.eup %3258 }
 0x1e3   : > { %3264 = vrcp.f32 %v1851_v36  ;;  %v4021_v10 = vpop.f32.mrb[52].mxu0  ;;  %v4028_v18 = vpop.eup %3260 }
 0x1e4   : > { %v4025_v52 = vpop.f32.mrb[53].mxu0  ;;  %v2302_v30 = vrot.slane %v2301_v42, 4  ;;  %v2309_v0 = vadd.f32 %v4023_v29, %v2308_v21 }
 0x1e6   : > { %v2303_v49 = vadd.f32 %v2302_v30, %v2301_v42  ;;  %v2310_v63 = vadd.f32 %v4028_v18, %v2309_v0 }
 0x1e7   : > { %v4031_v36 = vpop.f32.mrb[54].mxu0 }
 0x1e8   : > { %v4033_v13 = vpop.f32.mrb[55].mxu0  ;;  %v2304_v9 = vrot.slane %v2303_v49, 2  ;;  %v2311_v46 = vrot.slane %v2310_v63, 4 }
 0x1e9   : > { %v3263_v51 = vpop.eup %3262 }
 0x1ea   : > { %v4036_v48 = vmul.f32 %v3263_v51, %v3897_v5  ;;  %v4039_v2 = vmul.f32 %v3263_v51, %v3907_v17  ;;  %v4042_v21 = vmul.f32 %v3263_v51, %v3916_v16  ;;  %v4045_v30 = vmul.f32 %v3263_v51, %v3922_v32 }
 0x1eb   : > { %v2305_v0 = vadd.f32 %v2304_v9, %v2303_v49  ;;  %v2312_v42 = vadd.f32 %v2311_v46, %v2310_v63  ;;  %v4047_v33 = vpop.f32.mrb[56].mxu0 }
 0x1ec   : > { %4767 = vst [vmem:[#allocation13_spill] sm:$0xff] %v4036_v48  ;;  %4768 = vst [vmem:[#allocation14_spill] sm:$0xff] %v4039_v2  ;;  %v4049_v1 = vpop.f32.mrb[57].mxu0 }
 0x1ed   : > { %4769 = vst [vmem:[#allocation15_spill] sm:$0xff] %v4042_v21  ;;  %4770 = vst [vmem:[#allocation16_spill] sm:$0xff] %v4045_v30  ;;  %v3265_v17 = vpop.eup %3264  ;;  %v2306_v59 = vrot.slane %v2305_v0, 1  ;;  %v2313_v26 = vrot.slane %v2312_v42, 2  ;;  %v370_v30 = vld [vmem:[%s4731_s2 + $0x130] sm:$0xff] }
 0x1ee   : > { %v4056_v16 = vmul.f32 %v3265_v17, %v3927_v39  ;;  %v4059_v51 = vmul.f32 %v3265_v17, %v3935_v11  ;;  %v4062_v9 = vmul.f32 %v3265_v17, %v3942_v41  ;;  %v4065_v32 = vmul.f32 %v3265_v17, %v3947_v58  ;;  %v368_v41 = vld [vmem:[%s4731_s2 + $0x120] sm:$0xff] }
 0x1ef   : > { %v2307_v46 = vadd.f32 %v2306_v59, %v2305_v0  ;;  %v2314_v49 = vadd.f32 %v2313_v26, %v2312_v42  ;;  %v4067_v63 = vpop.f32.mrb[58].mxu0  ;;  %2955 = vmatmul.mubr.msk.f32.gmra.mrb[72].mxu0 %vm380_vm0, %v368_v41 }
 0x1f0   : > { %4771 = vst [vmem:[#allocation17_spill] sm:$0xff] %v4062_v9  ;;  %4772 = vst [vmem:[#allocation18_spill] sm:$0xff] %v4065_v32  ;;  %v4071_v31 = vpop.f32.mrb[59].mxu0 }
 0x1f1   : > { %3266 = vrcp.f32 %v2307_v46  ;;  %v2315_v58 = vrot.slane %v2314_v49, 1 }
 0x1f3   : > { %v2316_v59 = vadd.f32 %v2315_v58, %v2314_v49  ;;  %v4079_v26 = vpop.f32.mrb[60].mxu0  ;;  %v4773_v49 = vmov 0.0   ;;  %v369_v58 = vld [vmem:[%s4731_s2 + $0x128] sm:$0xff] }
 0x1f4   : > { %v4083_v42 = vpop.f32.mrb[61].mxu0  ;;  %811 = vmatprep.mubr.f32.mxu0 %v4773_v49 }
 0x1f5   : > { %3268 = vrcp.f32 %v2316_v59  ;;  %2956 = vmatmul.mubr.msk.f32.gmra.mrb[74].mxu0 %vm380_vm0, %v369_v58 }
 0x1f6   : > { %817 = vmatprep.mubr.f32.mxu0 %v4773_v49 }
 0x1f7   : > { %v4087_v39 = vpop.f32.mrb[62].mxu0 }
 0x1f8   : > { %v4092_v46 = vpop.f32.mrb[63].mxu0 }
 0x1f9   : > { %2957 = vmatmul.mubr.msk.f32.gmra.mrb[76].mxu0 %vm380_vm0, %v370_v30 }
 0x1fa   : > { %823 = vmatprep.mubr.f32.mxu0 %v4773_v49 }
 0x1fb   : > { %v3267_v11 = vpop.eup %3266  ;;  %v783_v0 = vpop.f32.mrb[64].mxu0 }
 0x1fc   : > { %v785_v17 = vpop.f32.mrb[65].mxu0  ;;  %v4101_v59 = vmul.f32 %v3267_v11, %v3995_v60  ;;  %v4104_v5 = vmul.f32 %v3267_v11, %v3999_v44  ;;  %v4107_v21 = vmul.f32 %v3267_v11, %v4003_v28  ;;  %v4110_v41 = vmul.f32 %v3267_v11, %v4009_v6 }
 0x1fe   : > { %4774 = vst [vmem:[#allocation19_spill] sm:$0xff] %v4101_v59  ;;  %4775 = vst [vmem:[#allocation20_spill] sm:$0xff] %v4107_v21  ;;  %v4787_v59 = vmax.f32 %v4007_v50, %v4011_v54 }
 0x1ff   : > { %4776 = vst [vmem:[#allocation21_spill] sm:$0xff] %v4110_v41  ;;  %v3269_v44 = vpop.eup %3268  ;;  %v789_v9 = vpop.f32.mrb[66].mxu0 }
 0x200   : > { %v3016_v32 = vpack.c.bf16 %v789_v9, %v783_v0  ;;  %v791_v28 = vpop.f32.mrb[67].mxu0  ;;  %v4122_v6 = vmul.f32 %v3269_v44, %v4013_v56  ;;  %v4125_v11 = vmul.f32 %v3269_v44, %v4016_v7  ;;  %v4128_v48 = vmul.f32 %v3269_v44, %v4023_v29  ;;  %v371_v9 = vld [vmem:[%s4731_s2 + $0x138] sm:$0xff] }
 0x201   : > { %v3014_v2 = vpack.c.bf16 %v791_v28, %v785_v17  ;;  %v4132_v60 = vmul.f32 %v3269_v44, %v4028_v18  ;;  %2958 = vmatmul.mubr.msk.f32.gmra.mrb[78].mxu0 %vm380_vm0, %v371_v9  ;;  %v372_v18 = vld [vmem:[%s4731_s2 + $0x140] sm:$0xff]  ;;  %v374_v9 = vld [vmem:[%s4731_s2 + $0x150] sm:$0xff] }
 0x202   : > { %4777 = vst [vmem:[#allocation22_spill] sm:$0xff] %v4128_v48  ;;  %829 = vmatprep.mubr.f32.mxu0 %v4773_v49 }
 0x203   : > { %4778 = vst [vmem:[#allocation23_spill] sm:$0xff] %v4132_v60  ;;  %3110 = vmatprep.subr.bf16.mxu1 %v3014_v2  ;;  %v795_v30 = vpop.f32.mrb[68].mxu0  ;;  %3015 = vmatprep.subr.bf16.mxu0 %v3014_v2  ;;  %v373_v2 = vld [vmem:[%s4731_s2 + $0x148] sm:$0xff] }
 0x204   : > { %3112 = vmatpush1.bf16.xpose.msra.mxu1 %v3016_v32  ;;  %v797_v29 = vpop.f32.mrb[69].mxu0  ;;  %3017 = vmatpush1.bf16.xpose.msra.mxu0 %v3016_v32  ;;  %v4779_v32 = vpack.c.bf16 %v3893_v37, %v3890_v57  ;;  %v376_v57 = vld [vmem:[%s4731_s2 + $0x160] sm:$0xff]  ;;  %v377_v37 = vld [vmem:[%s4731_s2 + $0x168] sm:$0xff] }
 0x205   : > { %2959 = vmatmul.mubr.msk.f32.gmra.mrb[80].mxu0 %vm380_vm0, %v372_v18 }
 0x206   : > { %835 = vmatprep.mubr.f32.mxu0 %v4773_v49 }
 0x207   : > { %v801_v0 = vpop.f32.mrb[70].mxu0 }
 0x208   : > { %v3020_v17 = vpack.c.bf16 %v801_v0, %v795_v30  ;;  %v803_v44 = vpop.f32.mrb[71].mxu0  ;;  %v375_v30 = vld [vmem:[%s4731_s2 + $0x158] sm:$0xff] }
 0x209   : > { %v3018_v28 = vpack.c.bf16 %v803_v44, %v797_v29  ;;  %2960 = vmatmul.mubr.msk.f32.gmra.mrb[82].mxu0 %vm380_vm0, %v373_v2 }
 0x20a   : > { %841 = vmatprep.mubr.f32.mxu0 %v4773_v49 }
 0x20b   : > { %3111 = vmatprep.subr.bf16.mxu1 %v3018_v28  ;;  %3019 = vmatprep.subr.bf16.mxu0 %v3018_v28 }
 0x20c   : > { %3113 = vmatpush1.bf16.xpose.msra.mxu1 %v3020_v17  ;;  %3021 = vmatpush1.bf16.xpose.msra.mxu0 %v3020_v17 }
 0x20d   : > { %3023 = vmatprep.subr.bf16.mxu1 %v4779_v32  ;;  %2961 = vmatmul.mubr.msk.f32.gmra.mrb[84].mxu0 %vm380_vm0, %v374_v9 }
 0x20e   : > { %847 = vmatprep.mubr.f32.mxu0 %v4773_v49 }
 0x211   : > { %2962 = vmatmul.mubr.msk.f32.gmra.mrb[86].mxu0 %vm380_vm0, %v375_v30 }
 0x212   : > { %853 = vmatprep.mubr.f32.mxu0 %v4773_v49 }
 0x215   : > { %2963 = vmatmul.mubr.msk.f32.gmra.mrb[88].mxu0 %vm380_vm0, %v376_v57 }
 0x216   : > { %859 = vmatprep.mubr.f32.mxu0 %v4773_v49 }
 0x219   : > { %2964 = vmatmul.mubr.msk.f32.gmra.mrb[90].mxu0 %vm380_vm0, %v377_v37 }
 0x21a   : > { %865 = vmatprep.mubr.f32.mxu0 %v4773_v49 }
 0x252   : > { %v954_v18 = vpop.xlane.xlu1 %953 }
 0x253   : > { %v964_v0 = vsub.f32 %v3837_v27, %v954_v18  ;;  %v965_v17 = vsub.f32 %v3842_v35, %v954_v18 }
 0x254   : > { %v957_v44 = vpop.xlane.xlu0 %956 }
 0x255   : > { %v966_v28 = vsub.f32 %v3859_v62, %v957_v44  ;;  %v967_v2 = vsub.f32 %v3864_v12, %v957_v44  ;;  %v972_v32 = vmul.f32 1.442695, %v964_v0  ;;  %v974_v9 = vmul.f32 1.442695, %v965_v17 }
 0x257   : > { %v976_v57 = vmul.f32 1.442695, %v966_v28  ;;  %v978_v37 = vmul.f32 1.442695, %v967_v2  ;;  %3270 = vpow2.f32 %v972_v32 }
 0x258   : > { %v960_v7 = vpop.xlane.xlu0 %959  ;;  %3272 = vpow2.f32 %v974_v9 }
 0x259   : > { %v968_v58 = vsub.f32 %v3867_v23, %v960_v7  ;;  %v969_v27 = vsub.f32 %v3871_v61, %v960_v7  ;;  %3274 = vpow2.f32 %v976_v57 }
 0x25a   : > { %3276 = vpow2.f32 %v978_v37 }
 0x25b   : > { %v980_v62 = vmul.f32 1.442695, %v968_v58  ;;  %v982_v12 = vmul.f32 1.442695, %v969_v27 }
 0x25c   : > { %v963_v18 = vpop.xlane.xlu0 %962 }
 0x25d   : > { %3278 = vpow2.f32 %v980_v62  ;;  %v970_v0 = vsub.f32 %v3877_v45, %v963_v18  ;;  %v971_v17 = vsub.f32 %v3882_v53, %v963_v18 }
 0x25e   : > { %3280 = vpow2.f32 %v982_v12 }
 0x25f   : > { %v984_v23 = vmul.f32 1.442695, %v970_v0  ;;  %v986_v28 = vmul.f32 1.442695, %v971_v17 }
 0x261   : > { %3282 = vpow2.f32 %v984_v23  ;;  %v3271_v61 = vpop.eup %3270  ;;  %v4780_v23 = vmax.f32 %v3899_v43, %v3909_v20 }
 0x262   : > { %3284 = vpow2.f32 %v986_v28  ;;  %v3273_v58 = vpop.eup %3272  ;;  %v4781_v28 = vmax.f32 %v3933_v3, %v3940_v34 }
 0x263   : > { %v3275_v2 = vpop.eup %3274  ;;  %v988_v32 = vadd.f32 %v3273_v58, %v3271_v61 }
 0x264   : > { %v3277_v9 = vpop.eup %3276 }
 0x265   : > { %989 = vadd.xlane.f32.xlu0 %v988_v32  ;;  %v991_v45 = vadd.f32 %v3277_v9, %v3275_v2  ;;  %v4782_v32 = vmax.f32 %v3952_v25, %v3955_v40 }
 0x267   : > { %v4196_v57 = vpop.eup %3278  ;;  %992 = vadd.xlane.f32.xlu1 %v991_v45  ;;  %v4783_v45 = vmax.f32 %v3959_v4, %v3964_v22 }
 0x268   : > { %v3281_v37 = vpop.eup %3280 }
 0x269   : > { %v994_v27 = vadd.f32 %v3281_v37, %v4196_v57 }
 0x26b   : > { %v4201_v12 = vpop.eup %3282  ;;  %995 = vadd.xlane.f32.xlu1 %v994_v27  ;;  %v378_v27 = vld [vmem:[%s4731_s2 + $0x170] sm:$0xff] }
 0x26c   : > { %v4203_v18 = vpop.eup %3284  ;;  %2965 = vmatmul.mubr.msk.f32.gmra.mrb[92].mxu0 %vm380_vm0, %v378_v27 }
 0x26d   : > { %v997_v0 = vadd.f32 %v4203_v18, %v4201_v12  ;;  %871 = vmatprep.mubr.f32.mxu0 %v4773_v49 }
 0x26f   : > { %998 = vadd.xlane.f32.xlu0 %v997_v0  ;;  %1305 = vmax.xlane.f32.xlu1 %v4780_v23  ;;  %v379_v0 = vld [vmem:[%s4731_s2 + $0x178] sm:$0xff] }
 0x270   : > { %2966 = vmatmul.mubr.msk.f32.gmra.mrb[94].mxu0 %vm380_vm0, %v379_v0 }
 0x273   : > { %1308 = vmax.xlane.f32.xlu0 %v4781_v28  ;;  %1311 = vmax.xlane.f32.xlu1 %v4782_v32 }
 0x277   : > { %1314 = vmax.xlane.f32.xlu0 %v4783_v45 }
 0x2f2   : > { %v990_v23 = vpop.xlane.xlu0 %989 }
 0x2f3   : > { %3286 = vrcp.f32 %v990_v23 }
 0x2f4   : > { %v993_v28 = vpop.xlane.xlu1 %992 }
 0x2f5   : > { %3288 = vrcp.f32 %v993_v28 }
 0x2f8   : > { %v996_v32 = vpop.xlane.xlu1 %995 }
 0x2f9   : > { %3290 = vrcp.f32 %v996_v32 }
 0x2fc   : > { %v999_v45 = vpop.xlane.xlu0 %998  ;;  %v1306_v56 = vpop.xlane.xlu1 %1305 }
 0x2fd   : > { %3292 = vrcp.f32 %v999_v45  ;;  %v3287_v17 = vpop.eup %3286  ;;  %v1316_v27 = vsub.f32 %v3899_v43, %v1306_v56  ;;  %v1317_v62 = vsub.f32 %v3909_v20, %v1306_v56 }
 0x2fe   : > { %v1001_v53 = vmul.f32 %v3287_v17, %v3271_v61  ;;  %v1002_v7 = vmul.f32 %v3287_v17, %v3273_v58 }
 0x2ff   : > { %v3289_v44 = vpop.eup %3288  ;;  %v1324_v29 = vmul.f32 1.442695, %v1316_v27  ;;  %v1326_v35 = vmul.f32 1.442695, %v1317_v62 }
 0x300   : > { %v1309_v0 = vpop.xlane.xlu0 %1308  ;;  %1076 = vmatprep.mubr.f32.mxu0 %v1002_v7  ;;  %v1312_v32 = vpop.xlane.xlu1 %1311  ;;  %v1005_v30 = vmul.f32 %v3289_v44, %v3277_v9  ;;  %v1004_v45 = vmul.f32 %v3289_v44, %v3275_v2 }
 0x301   : > { %v1318_v23 = vsub.f32 %v3933_v3, %v1309_v0  ;;  %v1319_v28 = vsub.f32 %v3940_v34, %v1309_v0  ;;  %3294 = vpow2.f32 %v1324_v29  ;;  %1077 = vmatmul.mubr.f32.vlgmr.msra.gmra.mrb[96].mxu0 %v1001_v53  ;;  %v1320_v43 = vsub.f32 %v3952_v25, %v1312_v32  ;;  %v807_v0 = vpop.f32.mrb[72].mxu0 }
 0x302   : > { %v1321_v20 = vsub.f32 %v3955_v40, %v1312_v32  ;;  %3296 = vpow2.f32 %v1326_v35  ;;  %1081 = vmatprep.mubr.f32.mxu1 %v1005_v30  ;;  %v4784_v34 = vpack.c.bf16 %v3885_v55, %v3880_v47  ;;  %v4785_v40 = vpack.c.bf16 %v3905_v8, %v3902_v14 }
 0x303   : > { %v1328_v56 = vmul.f32 1.442695, %v1318_v23  ;;  %v1330_v61 = vmul.f32 1.442695, %v1319_v28  ;;  %v3291_v58 = vpop.eup %3290  ;;  %v1332_v62 = vmul.f32 1.442695, %v1320_v43  ;;  %1082 = vmatmul.mubr.f32.vlgmr.msra.gmra.mrb[0].mxu1 %v1004_v45 }
 0x304   : > { %v1334_v7 = vmul.f32 1.442695, %v1321_v20  ;;  %v1315_v3 = vpop.xlane.xlu0 %1314  ;;  %3025 = vmatpush1.bf16.msra.mxu1 %v4784_v34  ;;  %v1008_v44 = vmul.f32 %v3291_v58, %v3281_v37  ;;  %v1007_v30 = vmul.f32 %v3291_v58, %v4196_v57  ;;  %v809_v23 = vpop.f32.mrb[73].mxu0 }
 0x305   : > { %3298 = vpow2.f32 %v1328_v56  ;;  %v1322_v29 = vsub.f32 %v3959_v4, %v1315_v3  ;;  %v1323_v25 = vsub.f32 %v3964_v22, %v1315_v3  ;;  %3027 = vmatprep.subr.bf16.mxu1 %v4785_v40  ;;  %v4786_v4 = vpack.c.bf16 %v3925_v38, %v3914_v24  ;;  %v813_v28 = vpop.f32.mrb[74].mxu0 }
 0x306   : > { %3300 = vpow2.f32 %v1330_v61  ;;  %1086 = vmatprep.mubr.f32.mxu1 %v1008_v44  ;;  %v3032_v32 = vpack.c.bf16 %v813_v28, %v807_v0  ;;  %v815_v45 = vpop.f32.mrb[75].mxu0 }
 0x307   : > { %v3293_v35 = vpop.eup %3292  ;;  %3302 = vpow2.f32 %v1332_v62  ;;  %v1336_v2 = vmul.f32 1.442695, %v1322_v29  ;;  %v1338_v9 = vmul.f32 1.442695, %v1323_v25  ;;  %1087 = vmatmul.mubr.f32.gmra.mrb[2].mxu1 %v1007_v30  ;;  %v3030_v43 = vpack.c.bf16 %v815_v45, %v809_v23  ;;  %v4275_v20 = vpop.f32.mrb[76].mxu0 }
 0x308   : > { %3304 = vpow2.f32 %v1334_v7  ;;  %v1011_v47 = vmul.f32 %v3293_v35, %v4203_v18  ;;  %v1010_v55 = vmul.f32 %v3293_v35, %v4201_v12  ;;  %3029 = vmatpush1.bf16.msra.mxu1 %v4786_v4  ;;  %v821_v56 = vpop.f32.mrb[77].mxu0 }
 0x309   : > { %3306 = vpow2.f32 %v1336_v2  ;;  %3031 = vmatprep.subr.bf16.mxu1 %v3030_v43  ;;  %v4277_v61 = vpop.f32.mrb[78].mxu0 }
 0x30a   : > { %3308 = vpow2.f32 %v1338_v9  ;;  %1091 = vmatprep.mubr.f32.mxu1 %v1011_v47  ;;  %v827_v62 = vpop.f32.mrb[79].mxu0 }
 0x30b   : > { %v4250_v14 = vpop.eup %3294  ;;  %1092 = vmatmul.mubr.f32.gmra.mrb[4].mxu1 %v1010_v55  ;;  %v3034_v7 = vpack.c.bf16 %v827_v62, %v821_v56  ;;  %v4281_v3 = vpop.f32.mrb[80].mxu0 }
 0x30c   : > { %v4252_v8 = vpop.eup %3296  ;;  %1209 = vmatprep.mubr.f32.mxu1 %v4773_v49  ;;  %v4283_v34 = vpop.f32.mrb[81].mxu0 }
 0x30d   : > { %v1340_v22 = vadd.f32 %v4252_v8, %v4250_v14  ;;  %v4285_v29 = vpop.f32.mrb[82].mxu0 }
 0x30e   : > { %v4289_v44 = vpop.f32.mrb[83].mxu0 }
 0x30f   : > { %v4257_v53 = vpop.eup %3298  ;;  %1341 = vadd.xlane.f32.xlu1 %v1340_v22  ;;  %v4293_v30 = vpop.f32.mrb[84].mxu0 }
 0x310   : > { %v4259_v57 = vpop.eup %3300  ;;  %v4295_v35 = vpop.f32.mrb[85].mxu0 }
 0x311   : > { %v4261_v37 = vpop.eup %3302  ;;  %v1343_v24 = vadd.f32 %v4259_v57, %v4257_v53  ;;  %v4297_v2 = vpop.f32.mrb[86].mxu0 }
 0x312   : > { %v4265_v38 = vpop.eup %3304  ;;  %v4301_v47 = vpop.f32.mrb[87].mxu0 }
 0x313   : > { %v4267_v12 = vpop.eup %3306  ;;  %v1346_v18 = vadd.f32 %v4265_v38, %v4261_v37  ;;  %1344 = vadd.xlane.f32.xlu0 %v1343_v24  ;;  %v4305_v4 = vpop.f32.mrb[88].mxu0 }
 0x314   : > { %v4271_v17 = vpop.eup %3308  ;;  %v4307_v22 = vpop.f32.mrb[89].mxu0 }
 0x315   : > { %1347 = vadd.xlane.f32.xlu1 %v1346_v18  ;;  %v1349_v27 = vadd.f32 %v4271_v17, %v4267_v12  ;;  %v4309_v24 = vpop.f32.mrb[90].mxu0 }
 0x317   : > { %1350 = vadd.xlane.f32.xlu0 %v1349_v27  ;;  %v4313_v27 = vpop.f32.mrb[91].mxu0 }
 0x33f   : > { %v4317_v23 = vpop.f32.mrb[92].mxu0 }
 0x340   : > { %v4319_v28 = vpop.f32.mrb[93].mxu0 }
 0x343   : > { %v4321_v45 = vpop.f32.mrb[94].mxu0 }
 0x344   : > { %v4325_v56 = vpop.f32.mrb[95].mxu0 }
 0x3d4   : > { %v1078_v18 = vpop.f32.mrb[96].mxu0 }
 0x3d5   : > { %v1097_v9 = vmul.f32 0.17677669, %v1078_v18  ;;  %v1080_v55 = vpop.f32.mrb[97].mxu0 }
 0x3d6   : > { %v1083_v25 = vpop.f32.mrb[0].mxu1  ;;  %v4788_v55 = vmax.f32 %v4021_v10, %v4025_v52 }
 0x3d7   : > { %1101 = vxpose.xlu1.b32.start [1/4] (short) (narrow) %v1097_v9, 32  ;;  %v1098_v0 = vmul.f32 0.17677669, %v1083_v25  ;;  %v1085_v40 = vpop.f32.mrb[1].mxu1  ;;  %v1342_v9 = vpop.xlane.xlu1 %1341 }
 0x3d8   : > { %3310 = vrcp.f32 %v1342_v9  ;;  %v1345_v40 = vpop.xlane.xlu0 %1344 }
 0x3d9   : > { %3312 = vrcp.f32 %v1345_v40  ;;  %v4794_v40 = vld [vmem:[#allocation5_spill] sm:$0xff] }
 0x3da   : > { %v1088_v58 = vpop.f32.mrb[2].mxu1 }
 0x3db   : > { %1102 = vxpose.xlu1.b32.cont [2/4] (short) (narrow) %v1098_v0, 32  ;;  %v1099_v21 = vmul.f32 0.17677669, %v1088_v58  ;;  %v1090_v41 = vpop.f32.mrb[3].mxu1  ;;  %v1348_v25 = vpop.xlane.xlu1 %1347  ;;  %v4791_v58 = vld [vmem:[#allocation9_spill] sm:$0xff] }
 0x3dc   : > { %3314 = vrcp.f32 %v1348_v25 }
 0x3de   : > { %v1093_v48 = vpop.f32.mrb[4].mxu1 }
 0x3df   : > { %1103 = vxpose.xlu1.b32.cont [3/4] (short) (narrow) %v1099_v21, 32  ;;  %v1100_v60 = vmul.f32 0.17677669, %v1093_v48  ;;  %v1095_v43 = vpop.f32.mrb[5].mxu1  ;;  %v1351_v21 = vpop.xlane.xlu0 %1350 }
 0x3e0   : > { %3316 = vrcp.f32 %v1351_v21  ;;  %v4797_v21 = vld [vmem:[#allocation11_spill] sm:$0xff] }
 0x3e2   : > { %v3311_v41 = vpop.eup %3310 }
 0x3e3   : > { %1104 = vxpose.xlu1.b32.end [4/4] (short) (narrow) %v1100_v60, 32  ;;  %v4789_v60 = vpack.c.bf16 %v4277_v61, %v4275_v20  ;;  %v1354_v43 = vmul.f32 %v3311_v41, %v4252_v8  ;;  %v1353_v9 = vmul.f32 %v3311_v41, %v4250_v14  ;;  %v4793_v61 = vld [vmem:[#allocation6_spill] sm:$0xff]  ;;  %v4799_v14 = vld [vmem:[#allocation8_spill] sm:$0xff]  ;;  %v4800_v41 = vld [vmem:[#allocation7_spill] sm:$0xff] }
 0x40a   : > { %1866 = vmax.xlane.f32.xlu1 %v4787_v59 }
 0x40e   : > { %1869 = vmax.xlane.f32.xlu1 %v4788_v55  ;;  %v3313_v55 = vpop.eup %3312 }
 0x40f   : > { %v1357_v25 = vmul.f32 %v3313_v55, %v4259_v57  ;;  %v3315_v20 = vpop.eup %3314  ;;  %v1356_v8 = vmul.f32 %v3313_v55, %v4257_v53  ;;  %v4801_v57 = vpack.c.bf16 %v4799_v14, %v4800_v41 }
 0x457   : > { %v1117_v18 = vpop.trf.xlu1 }
 0x458   : > { %2967 = vmatmul.mubr.msk.f32.vlgmr.msra.gmra.mrb[6].mxu1 %vm380_vm0, %v1117_v18  ;;  %v4795_v18 = vpack.c.bf16 %v4793_v61, %v4794_v40 }
 0x459   : > { %3033 = vmatpush1.bf16.xpose.msra.mxu1 %v3032_v32  ;;  %1215 = vmatprep.mubr.f32.mxu1 %v4773_v49  ;;  %v4790_v32 = vld [vmem:[#allocation10_spill] sm:$0xff] }
 0x45a   : > { %3035 = vmatprep.subr.bf16.mxu1 %v3034_v7  ;;  %v4792_v7 = vpack.c.bf16 %v4790_v32, %v4791_v58  ;;  %v3317_v32 = vpop.eup %3316  ;;  %v1359_v58 = vmul.f32 %v3315_v20, %v4261_v37 }
 0x45b   : > { %v1118_v48 = vpop.trf.xlu1 }
 0x45c   : > { %2968 = vmatmul.mubr.msk.f32.gmra.mrb[8].mxu1 %vm380_vm0, %v1118_v48  ;;  %v4796_v48 = vld [vmem:[#allocation12_spill] sm:$0xff] }
 0x45d   : > { %1221 = vmatprep.mubr.f32.mxu1 %v4773_v49 }
 0x45f   : > { %v1119_v59 = vpop.trf.xlu1 }
 0x460   : > { %2969 = vmatmul.mubr.msk.f32.gmra.mrb[10].mxu1 %vm380_vm0, %v1119_v59  ;;  %v4798_v59 = vpack.c.bf16 %v4796_v48, %v4797_v21 }
 0x461   : > { %3037 = vmatpush1.bf16.xpose.msra.mxu1 %v4789_v60  ;;  %1227 = vmatprep.mubr.f32.mxu1 %v4773_v49  ;;  %v1360_v60 = vmul.f32 %v3315_v20, %v4265_v38 }
 0x462   : > { %3039 = vmatprep.subr.bf16.mxu1 %v4792_v7  ;;  %v1363_v7 = vmul.f32 %v3317_v32, %v4271_v17 }
 0x463   : > { %v1120_v0 = vpop.trf.xlu1 }
 0x464   : > { %2970 = vmatmul.mubr.msk.f32.gmra.mrb[12].mxu1 %vm380_vm0, %v1120_v0  ;;  %v1362_v0 = vmul.f32 %v3317_v32, %v4267_v12 }
 0x465   : > { %1428 = vmatprep.mubr.f32.mxu1 %v1354_v43 }
 0x468   : > { %1429 = vmatmul.mubr.f32.vlgmr.msra.gmra.mrb[14].mxu1 %v1353_v9 }
 0x469   : > { %3041 = vmatpush1.bf16.msra.mxu1 %v4795_v18  ;;  %1433 = vmatprep.mubr.f32.mxu1 %v1357_v25 }
 0x46a   : > { %3043 = vmatprep.subr.bf16.mxu1 %v4798_v59 }
 0x46c   : > { %1434 = vmatmul.mubr.f32.gmra.mrb[16].mxu1 %v1356_v8 }
 0x46d   : > { %3045 = vmatpush1.bf16.msra.mxu1 %v4801_v57  ;;  %1438 = vmatprep.mubr.f32.mxu1 %v1360_v60 }
 0x470   : > { %1439 = vmatmul.mubr.f32.gmra.mrb[18].mxu1 %v1359_v58 }
 0x471   : > { %1443 = vmatprep.mubr.f32.mxu1 %v1363_v7 }
 0x474   : > { %1444 = vmatmul.mubr.f32.gmra.mrb[20].mxu1 %v1362_v0  ;;  %v4393_v0 = vld [vmem:[%s4732_s3] sm:$0xff] }
 0x475   : > { %1561 = vmatprep.mubr.f32.mxu1 %v4773_v49  ;;  %1590 = vrot.lane.b32.xlu1 %v4393_v0, %s3436_s15 }
 0x52b   : > { %v4366_v53 = vpop.f32.mrb[6].mxu1 }
 0x52c   : > { %v4368_v38 = vpop.f32.mrb[7].mxu1 }
 0x52f   : > { %v4370_v43 = vpop.f32.mrb[8].mxu1 }
 0x530   : > { %v4374_v9 = vpop.f32.mrb[9].mxu1 }
 0x533   : > { %v4378_v17 = vpop.f32.mrb[10].mxu1 }
 0x534   : > { %v4380_v12 = vpop.f32.mrb[11].mxu1 }
 0x537   : > { %v4382_v25 = vpop.f32.mrb[12].mxu1 }
 0x538   : > { %v4386_v61 = vpop.f32.mrb[13].mxu1 }
 0x53b   : > { %v1430_v18 = vpop.f32.mrb[14].mxu1 }
 0x53c   : > { %v1449_v48 = vmul.f32 0.17677669, %v1430_v18  ;;  %v1432_v21 = vpop.f32.mrb[15].mxu1  ;;  %v4802_v18 = vmax.f32 %v3979_v19, %v3987_v15 }
 0x53d   : > { %v4406_v21 = vld [vmem:[%s4732_s3 + $0x8] sm:$0xff] }
 0x53e   : > { %1453 = vxpose.xlu0.b32.start [1/4] (short) (narrow) %v1449_v48, 32  ;;  %v4803_v48 = vmax.f32 %v4031_v36, %v4033_v13 }
 0x53f   : > { %v1435_v59 = vpop.f32.mrb[16].mxu1 }
 0x540   : > { %v1450_v8 = vmul.f32 0.17677669, %v1435_v59  ;;  %v1437_v60 = vpop.f32.mrb[17].mxu1  ;;  %v4413_v59 = vld [vmem:[%s4732_s3 + $0x10] sm:$0xff] }
 0x542   : > { %1454 = vxpose.xlu0.b32.cont [2/4] (short) (narrow) %v1450_v8, 32  ;;  %v1867_v8 = vpop.xlane.xlu1 %1866 }
 0x543   : > { %v1440_v32 = vpop.f32.mrb[18].mxu1  ;;  %v1876_v60 = vsub.f32 %v4007_v50, %v1867_v8 }
 0x544   : > { %v1451_v14 = vmul.f32 0.17677669, %v1440_v32  ;;  %v1442_v41 = vpop.f32.mrb[19].mxu1  ;;  %v1877_v32 = vsub.f32 %v4011_v54, %v1867_v8 }
 0x545   : > { %v1886_v41 = vmul.f32 1.442695, %v1876_v60 }
 0x546   : > { %1455 = vxpose.xlu0.b32.cont [3/4] (short) (narrow) %v1451_v14, 32  ;;  %v1870_v14 = vpop.xlane.xlu1 %1869 }
 0x547   : > { %v1445_v57 = vpop.f32.mrb[20].mxu1  ;;  %3318 = vpow2.f32 %v1886_v41 }
 0x548   : > { %v1452_v58 = vmul.f32 0.17677669, %v1445_v57  ;;  %v1447_v7 = vpop.f32.mrb[21].mxu1  ;;  %v1878_v57 = vsub.f32 %v4021_v10, %v1870_v14 }
 0x549   : > { %v1879_v7 = vsub.f32 %v4025_v52, %v1870_v14 }
 0x54a   : > { %1456 = vxpose.xlu0.b32.end [4/4] (short) (narrow) %v1452_v58, 32  ;;  %v1888_v58 = vmul.f32 1.442695, %v1877_v32 }
 0x54c   : > { %3320 = vpow2.f32 %v1888_v58 }
 0x551   : > { %v4421_v62 = vpop.eup %3318 }
 0x556   : > { %v4423_v20 = vpop.eup %3320 }
 0x557   : > { %v1901_v54 = vadd.f32 %v4423_v20, %v4421_v62 }
 0x577   : > { %1863 = vmax.xlane.f32.xlu0 %v4802_v18  ;;  %v1890_v18 = vmul.f32 1.442695, %v1878_v57 }
 0x579   : > { %3322 = vpow2.f32 %v1890_v18 }
 0x57b   : > { %1872 = vmax.xlane.f32.xlu0 %v4803_v48  ;;  %v1892_v48 = vmul.f32 1.442695, %v1879_v7 }
 0x57d   : > { %3324 = vpow2.f32 %v1892_v48 }
 0x583   : > { %v4425_v50 = vpop.eup %3322 }
 0x587   : > { %v4429_v8 = vpop.eup %3324 }
 0x588   : > { %v1904_v52 = vadd.f32 %v4429_v8, %v4425_v50 }
 0x591   : > { %1592 = vrot.lane.b32.xlu0 %v4406_v21, %s3436_s15 }
 0x595   : > { %1594 = vrot.lane.b32.xlu0 %v4413_v59, %s3436_s15 }
 0x5b4   : > { %1902 = vadd.xlane.f32.xlu0 %v1901_v54 }
 0x5b8   : > { %1905 = vadd.xlane.f32.xlu0 %v1904_v52 }
 0x5be   : > { %v1469_v10 = vpop.trf.xlu0 }
 0x5bf   : > { %2971 = vmatmul.mubr.msk.f32.vlgmr.msra.gmra.mrb[22].mxu1 %vm380_vm0, %v1469_v10 }
 0x5c0   : > { %1567 = vmatprep.mubr.f32.mxu1 %v4773_v49 }
 0x5c2   : > { %v1470_v60 = vpop.trf.xlu0 }
 0x5c3   : > { %2972 = vmatmul.mubr.msk.f32.gmra.mrb[24].mxu1 %vm380_vm0, %v1470_v60 }
 0x5c4   : > { %1573 = vmatprep.mubr.f32.mxu1 %v4773_v49 }
 0x5c6   : > { %v1471_v32 = vpop.trf.xlu0 }
 0x5c7   : > { %2973 = vmatmul.mubr.msk.f32.gmra.mrb[26].mxu1 %vm380_vm0, %v1471_v32 }
 0x5c8   : > { %1579 = vmatprep.mubr.f32.mxu1 %v4773_v49 }
 0x5ca   : > { %v1472_v14 = vpop.trf.xlu0 }
 0x5cb   : > { %2974 = vmatmul.mubr.msk.f32.gmra.mrb[28].mxu1 %vm380_vm0, %v1472_v14 }
 0x5cc   : > { %1670 = vmatprep.mubr.f32.mxu1 %v4773_v49 }
 0x604   : > { %v1864_v41 = vpop.xlane.xlu0 %1863 }
 0x605   : > { %v1874_v57 = vsub.f32 %v3979_v19, %v1864_v41  ;;  %v1875_v58 = vsub.f32 %v3987_v15, %v1864_v41 }
 0x607   : > { %v1882_v7 = vmul.f32 1.442695, %v1874_v57  ;;  %v1884_v18 = vmul.f32 1.442695, %v1875_v58  ;;  %v4804_v57 = vmax.f32 %v4047_v33, %v4049_v1  ;;  %v4805_v58 = vmax.f32 %v4067_v63, %v4071_v31 }
 0x608   : > { %v1873_v48 = vpop.xlane.xlu0 %1872 }
 0x609   : > { %3326 = vpow2.f32 %v1882_v7  ;;  %v1880_v54 = vsub.f32 %v4031_v36, %v1873_v48  ;;  %v1881_v52 = vsub.f32 %v4033_v13, %v1873_v48  ;;  %v4460_v13 = vld [vmem:[%s4732_s3 + $0x18] sm:$0xff]  ;;  %v4806_v7 = vmax.f32 %v4079_v26, %v4083_v42 }
 0x60a   : > { %3328 = vpow2.f32 %v1884_v18  ;;  %v4807_v18 = vmax.f32 %v4087_v39, %v4092_v46 }
 0x60b   : > { %v1894_v10 = vmul.f32 1.442695, %v1880_v54  ;;  %v1896_v60 = vmul.f32 1.442695, %v1881_v52 }
 0x60d   : > { %3330 = vpow2.f32 %v1894_v10 }
 0x60e   : > { %3332 = vpow2.f32 %v1896_v60 }
 0x613   : > { %v4445_v32 = vpop.eup %3326 }
 0x614   : > { %v4447_v14 = vpop.eup %3328 }
 0x615   : > { %v1898_v19 = vadd.f32 %v4447_v14, %v4445_v32 }
 0x617   : > { %v4451_v15 = vpop.eup %3330  ;;  %1899 = vadd.xlane.f32.xlu1 %v1898_v19 }
 0x618   : > { %v4453_v41 = vpop.eup %3332 }
 0x619   : > { %v1907_v36 = vadd.f32 %v4453_v41, %v4451_v15 }
 0x61b   : > { %1908 = vadd.xlane.f32.xlu0 %v1907_v36 }
 0x628   : > { %1596 = vrot.lane.b32.xlu1 %v4460_v13, %s3436_s15 }
 0x64c   : > { %2328 = vmax.xlane.f32.xlu1 %v4804_v57 }
 0x650   : > { %2331 = vmax.xlane.f32.xlu1 %v4805_v58 }
 0x654   : > { %2334 = vmax.xlane.f32.xlu1 %v4806_v7  ;;  %v4808_v7 = vpack.c.bf16 %v4374_v9, %v4368_v38  ;;  %v4811_v38 = vpack.c.bf16 %v4382_v25, %v4378_v17  ;;  %v4812_v9 = vpack.c.bf16 %v4289_v44, %v4283_v34  ;;  %v4813_v17 = vpack.c.bf16 %v4285_v29, %v4281_v3 }
 0x655   : > { %v4814_v34 = vpack.c.bf16 %v4301_v47, %v4295_v35  ;;  %v4815_v3 = vpack.c.bf16 %v4297_v2, %v4293_v30  ;;  %v4816_v29 = vpack.c.bf16 %v4059_v51, %v4056_v16  ;;  %v4817_v2 = vld [vmem:[#allocation14_spill] sm:$0xff]  ;;  %v4821_v51 = vld [vmem:[#allocation17_spill] sm:$0xff] }
 0x656   : > { %v4820_v16 = vld [vmem:[#allocation18_spill] sm:$0xff] }
 0x658   : > { %2337 = vmax.xlane.f32.xlu1 %v4807_v18  ;;  %v1591_v18 = vpop.permute.xlu1 %1590 }
 0x692   : > { %v1563_v48 = vpop.f32.mrb[22].mxu1 }
 0x693   : > { %v1565_v54 = vpop.f32.mrb[23].mxu1 }
 0x696   : > { %v1569_v52 = vpop.f32.mrb[24].mxu1 }
 0x697   : > { %v3048_v10 = vpack.c.bf16 %v1569_v52, %v1563_v48  ;;  %v1571_v60 = vpop.f32.mrb[25].mxu1  ;;  %v1593_v48 = vpop.permute.xlu0 %1592 }
 0x698   : > { %v3046_v19 = vpack.c.bf16 %v1571_v60, %v1565_v54  ;;  %v4809_v54 = vpack.c.bf16 %v4370_v43, %v4366_v53 }
 0x69a   : > { %v1575_v36 = vpop.f32.mrb[26].mxu1  ;;  %3047 = vmatprep.subr.bf16.mxu1 %v3046_v19  ;;  %v4822_v19 = vpack.c.bf16 %v4820_v16, %v4821_v51 }
 0x69b   : > { %v1577_v57 = vpop.f32.mrb[27].mxu1  ;;  %3049 = vmatpush1.bf16.msra.mxu1 %v3048_v10  ;;  %v1595_v53 = vpop.permute.xlu0 %1594  ;;  %v4818_v10 = vld [vmem:[#allocation13_spill] sm:$0xff] }
 0x69c   : > { %v4819_v60 = vpack.c.bf16 %v4817_v2, %v4818_v10  ;;  %v2756_v2 = vld [vmem:[%s4734_s5 + $0x10] sm:$0xff] }
 0x69d   : > { %v2760_v10 = vmul.f32 5.656854, %v2756_v2 }
 0x69e   : > { %v1581_v40 = vpop.f32.mrb[28].mxu1 }
 0x69f   : > { %v3052_v58 = vpack.c.bf16 %v1581_v40, %v1575_v36  ;;  %v1583_v55 = vpop.f32.mrb[29].mxu1  ;;  %v4810_v40 = vpack.c.bf16 %v4386_v61, %v4380_v12 }
 0x6a0   : > { %v3050_v37 = vpack.c.bf16 %v1583_v55, %v1577_v57 }
 0x6a2   : > { %3051 = vmatprep.subr.bf16.mxu1 %v3050_v37  ;;  %v1903_v37 = vpop.xlane.xlu0 %1902 }
 0x6a3   : > { %3053 = vmatpush1.bf16.msra.mxu1 %v3052_v58  ;;  %v4824_v58 = vld [vmem:[#allocation15_spill] sm:$0xff] }
 0x6a4   : > { %3055 = vmatprep.subr.bf16.mxu1 %v4808_v7  ;;  %v1900_v55 = vpop.xlane.xlu1 %1899 }
 0x6a5   : > { %3334 = vrcp.f32 %v1900_v55 }
 0x6a6   : > { %2975 = vmatmul.mubr.msk.f32.vlgmr.msra.gmra.mrb[30].mxu1 %vm380_vm0, %v1591_v18  ;;  %3336 = vrcp.f32 %v1903_v37  ;;  %v1906_v44 = vpop.xlane.xlu0 %1905 }
 0x6a7   : > { %3057 = vmatpush1.bf16.msra.mxu1 %v4809_v54  ;;  %1676 = vmatprep.mubr.f32.mxu1 %v4773_v49  ;;  %3338 = vrcp.f32 %v1906_v44 }
 0x6a8   : > { %3059 = vmatprep.subr.bf16.mxu1 %v4810_v40  ;;  %v1597_v43 = vpop.permute.xlu1 %1596 }
 0x6aa   : > { %2976 = vmatmul.mubr.msk.f32.gmra.mrb[32].mxu1 %vm380_vm0, %v1593_v48  ;;  %v1909_v12 = vpop.xlane.xlu0 %1908 }
 0x6ab   : > { %3061 = vmatpush1.bf16.msra.mxu1 %v4811_v38  ;;  %1682 = vmatprep.mubr.f32.mxu1 %v4773_v49  ;;  %3340 = vrcp.f32 %v1909_v12 }
 0x6ac   : > { %3063 = vmatprep.subr.bf16.mxu1 %v4812_v9 }
 0x6ae   : > { %2977 = vmatmul.mubr.msk.f32.gmra.mrb[34].mxu1 %vm380_vm0, %v1595_v53 }
 0x6af   : > { %1688 = vmatprep.mubr.f32.mxu1 %v4773_v49  ;;  %v3335_v25 = vpop.eup %3334 }
 0x6b0   : > { %v1912_v35 = vmul.f32 %v3335_v25, %v4447_v14  ;;  %v3337_v47 = vpop.eup %3336  ;;  %v1911_v61 = vmul.f32 %v3335_v25, %v4445_v32  ;;  %v4823_v32 = vld [vmem:[#allocation16_spill] sm:$0xff] }
 0x6b1   : > { %v1915_v52 = vmul.f32 %v3337_v47, %v4423_v20  ;;  %v3339_v30 = vpop.eup %3338  ;;  %v1914_v14 = vmul.f32 %v3337_v47, %v4421_v62  ;;  %v4825_v20 = vpack.c.bf16 %v4823_v32, %v4824_v58  ;;  %v2754_v47 = vld [vmem:[%s4734_s5] sm:$0xff] }
 0x6b2   : > { %2978 = vmatmul.mubr.msk.f32.gmra.mrb[36].mxu1 %vm380_vm0, %v1597_v43  ;;  %v1918_v36 = vmul.f32 %v3339_v30, %v4429_v8  ;;  %v1917_v7 = vmul.f32 %v3339_v30, %v4425_v50 }
 0x6b3   : > { %1767 = vmatprep.mubr.f32.mxu1 %v4773_v49 }
 0x6b5   : > { %v3341_v57 = vpop.eup %3340 }
 0x6b6   : > { %2979 = vmatmul.mubr.msk.f32.vlgmr.msra.gmra.mrb[30].mxu1 %vm380_vm0, %v4393_v0  ;;  %v1921_v18 = vmul.f32 %v3341_v57, %v4453_v41  ;;  %v1920_v48 = vmul.f32 %v3341_v57, %v4451_v15 }
 0x6b7   : > { %3065 = vmatpush1.bf16.xpose.msra.mxu1 %v4813_v17  ;;  %1773 = vmatprep.mubr.f32.mxu1 %v4773_v49 }
 0x6b8   : > { %3067 = vmatprep.subr.bf16.mxu1 %v4814_v34 }
 0x6ba   : > { %2980 = vmatmul.mubr.msk.f32.gmra.mrb[32].mxu1 %vm380_vm0, %v4406_v21 }
 0x6bb   : > { %1779 = vmatprep.mubr.f32.mxu1 %v4773_v49 }
 0x6be   : > { %2981 = vmatmul.mubr.msk.f32.gmra.mrb[34].mxu1 %vm380_vm0, %v4413_v59 }
 0x6bf   : > { %3069 = vmatpush1.bf16.xpose.msra.mxu1 %v4815_v3  ;;  %1785 = vmatprep.mubr.f32.mxu1 %v4773_v49 }
 0x6c0   : > { %3071 = vmatprep.subr.bf16.mxu1 %v4816_v29 }
 0x6c2   : > { %2982 = vmatmul.mubr.msk.f32.gmra.mrb[36].mxu1 %vm380_vm0, %v4460_v13 }
 0x6c3   : > { %1986 = vmatprep.mubr.f32.mxu1 %v1912_v35 }
 0x6c6   : > { %1987 = vmatmul.mubr.f32.vlgmr.msra.gmra.mrb[38].mxu1 %v1911_v61  ;;  %v2758_v61 = vmul.f32 5.656854, %v2754_v47  ;;  %v4827_v47 = vpack.c.bf16 %v4309_v24, %v4305_v4  ;;  %v4829_v4 = vpack.c.bf16 %v4321_v45, %v4317_v23  ;;  %v4830_v24 = vpack.c.bf16 %v4125_v11, %v4122_v6  ;;  %v4834_v23 = vld [vmem:[#allocation22_spill] sm:$0xff] }
 0x6c7   : > { %3073 = vmatpush1.bf16.msra.mxu1 %v4819_v60  ;;  %1991 = vmatprep.mubr.f32.mxu1 %v1915_v52  ;;  %v2755_v52 = vld [vmem:[%s4734_s5 + $0x8] sm:$0xff] }
 0x6c8   : > { %3075 = vmatprep.subr.bf16.mxu1 %v4822_v19  ;;  %v2759_v30 = vmul.f32 5.656854, %v2755_v52 }
 0x6ca   : > { %1992 = vmatmul.mubr.f32.gmra.mrb[40].mxu1 %v1914_v14 }
 0x6cb   : > { %3077 = vmatpush1.bf16.msra.mxu1 %v4825_v20  ;;  %1996 = vmatprep.mubr.f32.mxu1 %v1918_v36 }
 0x6ce   : > { %1997 = vmatmul.mubr.f32.gmra.mrb[42].mxu1 %v1917_v7 }
 0x6cf   : > { %2001 = vmatprep.mubr.f32.mxu1 %v1921_v18 }
 0x6d2   : > { %2002 = vmatmul.mubr.f32.gmra.mrb[44].mxu1 %v1920_v48 }
 0x6d3   : > { %2119 = vmatprep.mubr.f32.mxu1 %v4773_v49 }
 0x6d9   : > { %v2329_v62 = vpop.xlane.xlu1 %2328 }
 0x6da   : > { %v2339_v8 = vsub.f32 %v4047_v33, %v2329_v62  ;;  %v2340_v54 = vsub.f32 %v4049_v1, %v2329_v62 }
 0x6dc   : > { %v2347_v40 = vmul.f32 1.442695, %v2339_v8  ;;  %v2349_v55 = vmul.f32 1.442695, %v2340_v54 }
 0x6dd   : > { %v2332_v38 = vpop.xlane.xlu1 %2331 }
 0x6de   : > { %3342 = vpow2.f32 %v2347_v40  ;;  %v2341_v50 = vsub.f32 %v4067_v63, %v2332_v38  ;;  %v2342_v41 = vsub.f32 %v4071_v31, %v2332_v38 }
 0x6df   : > { %3344 = vpow2.f32 %v2349_v55 }
 0x6e0   : > { %v2351_v9 = vmul.f32 1.442695, %v2341_v50  ;;  %v2353_v53 = vmul.f32 1.442695, %v2342_v41 }
 0x6e1   : > { %v4544_v15 = vpop.xlane.xlu1 %2334 }
 0x6e2   : > { %3346 = vpow2.f32 %v2351_v9  ;;  %v2343_v43 = vsub.f32 %v4079_v26, %v4544_v15  ;;  %v2344_v1 = vsub.f32 %v4083_v42, %v4544_v15 }
 0x6e3   : > { %3348 = vpow2.f32 %v2353_v53 }
 0x6e4   : > { %v2355_v48 = vmul.f32 1.442695, %v2343_v43  ;;  %v2357_v62 = vmul.f32 1.442695, %v2344_v1 }
 0x6e5   : > { %v2338_v26 = vpop.xlane.xlu1 %2337 }
 0x6e6   : > { %v2345_v42 = vsub.f32 %v4087_v39, %v2338_v26  ;;  %v2346_v44 = vsub.f32 %v4092_v46, %v2338_v26  ;;  %v2722_v39 = vld [vmem:[%s4733_s4] sm:$0xff]  ;;  %v2723_v46 = vld [vmem:[%s4733_s4 + $0x8] sm:$0xff] }
 0x6e8   : > { %v4550_v33 = vpop.eup %3342  ;;  %v2359_v12 = vmul.f32 1.442695, %v2345_v42  ;;  %v2361_v25 = vmul.f32 1.442695, %v2346_v44 }
 0x6e9   : > { %v4552_v37 = vpop.eup %3344 }
 0x6ea   : > { %v2363_v31 = vadd.f32 %v4552_v37, %v4550_v33  ;;  %3350 = vpow2.f32 %v2359_v12 }
 0x6eb   : > { %3352 = vpow2.f32 %v2361_v25 }
 0x6ec   : > { %v4556_v63 = vpop.eup %3346  ;;  %2364 = vadd.xlane.f32.xlu1 %v2363_v31  ;;  %3354 = vpow2.f32 %v2355_v48 }
 0x6ed   : > { %v4558_v17 = vpop.eup %3348  ;;  %3356 = vpow2.f32 %v2357_v62 }
 0x6ee   : > { %v2366_v34 = vadd.f32 %v4558_v17, %v4556_v63 }
 0x6f0   : > { %2367 = vadd.xlane.f32.xlu1 %v2366_v34 }
 0x6f4   : > { %v4566_v3 = vpop.eup %3350 }
 0x6f5   : > { %v4568_v29 = vpop.eup %3352 }
 0x6f6   : > { %v2372_v35 = vadd.f32 %v4568_v29, %v4566_v3  ;;  %v4599_v8 = vpop.eup %3354 }
 0x6f7   : > { %v4601_v54 = vpop.eup %3356 }
 0x6f8   : > { %v2369_v40 = vadd.f32 %v4601_v54, %v4599_v8 }
 0x701   : > { %2144 = vrot.lane.b32.xlu1 %v4393_v0, %s3437_s28 }
 0x725   : > { %2373 = vadd.xlane.f32.xlu1 %v2372_v35 }
 0x736   : > { %2148 = vrot.lane.b32.xlu1 %v4413_v59, %s3437_s28 }
 0x73a   : > { %2609 = vrot.lane.b32.xlu1 %v4393_v0, %s3438_s29  ;;  %v2724_v0 = vld [vmem:[%s4733_s4 + $0x10] sm:$0xff] }
 0x73e   : > { %2611 = vrot.lane.b32.xlu1 %v4406_v21, %s3438_s29 }
 0x742   : > { %2613 = vrot.lane.b32.xlu1 %v4413_v59, %s3438_s29  ;;  %v2725_v59 = vld [vmem:[%s4733_s4 + $0x18] sm:$0xff] }
 0x746   : > { %2615 = vrot.lane.b32.xlu1 %v4460_v13, %s3438_s29 }
 0x74a   : > { %2728 = vperm.xlu1 %3185, %v2722_v39  }
 0x74e   : > { %2733 = vperm.xlu1 %3185, %v2723_v46   ;;  %v4826_v46 = vpack.c.bf16 %v4313_v27, %v4307_v22  ;;  %v4828_v22 = vpack.c.bf16 %v4325_v56, %v4319_v28 }
 0x752   : > { %2738 = vperm.xlu1 %3185, %v2724_v0  }
 0x756   : > { %2743 = vperm.xlu1 %3185, %v2725_v59  }
 0x75a   : > { %2802 = vperm.xlu1 %3185, %v2758_v61  }
 0x75e   : > { %2807 = vperm.xlu1 %3185, %v2759_v30  }
 0x762   : > { %2812 = vperm.xlu1 %3185, %v2760_v10  }
 0x779   : > { %v2365_v53 = vpop.xlane.xlu1 %2364 }
 0x77a   : > { %3358 = vrcp.f32 %v2365_v53 }
 0x77d   : > { %v2368_v26 = vpop.xlane.xlu1 %2367 }
 0x77e   : > { %3360 = vrcp.f32 %v2368_v26 }
 0x781   : > { %v2145_v35 = vpop.permute.xlu1 %2144 }
 0x784   : > { %v3359_v27 = vpop.eup %3358 }
 0x785   : > { %v2377_v30 = vmul.f32 %v3359_v27, %v4552_v37  ;;  %v2376_v56 = vmul.f32 %v3359_v27, %v4550_v33  ;;  %v4831_v37 = vld [vmem:[#allocation19_spill] sm:$0xff]  ;;  %v4836_v33 = vld [vmem:[#allocation21_spill] sm:$0xff] }
 0x788   : > { %v3361_v28 = vpop.eup %3360 }
 0x789   : > { %v2380_v2 = vmul.f32 %v3361_v28, %v4558_v17  ;;  %v4837_v17 = vld [vmem:[#allocation20_spill] sm:$0xff] }
 0x799   : > { %v1988_v60 = vpop.f32.mrb[38].mxu1 }
 0x79a   : > { %v2007_v16 = vmul.f32 0.17677669, %v1988_v60  ;;  %v1990_v51 = vpop.f32.mrb[39].mxu1  ;;  %v4832_v60 = vpack.c.bf16 %v4104_v5, %v4831_v37 }
 0x79b   : > { %v2379_v51 = vmul.f32 %v3361_v28, %v4556_v63 }
 0x79c   : > { %2011 = vxpose.xlu0.b32.start [1/4] (short) (narrow) %v2007_v16, 32  ;;  %v4833_v16 = vld [vmem:[#allocation23_spill] sm:$0xff] }
 0x79d   : > { %v1993_v19 = vpop.f32.mrb[40].mxu1  ;;  %v4835_v45 = vpack.c.bf16 %v4833_v16, %v4834_v23 }
 0x79e   : > { %v2008_v14 = vmul.f32 0.17677669, %v1993_v19  ;;  %v1995_v36 = vpop.f32.mrb[41].mxu1  ;;  %v4838_v19 = vpack.c.bf16 %v4836_v33, %v4837_v17 }
 0x7a0   : > { %2012 = vxpose.xlu0.b32.cont [2/4] (short) (narrow) %v2008_v14, 32 }
 0x7a1   : > { %v1998_v57 = vpop.f32.mrb[42].mxu1 }
 0x7a2   : > { %v2009_v32 = vmul.f32 0.17677669, %v1998_v57  ;;  %v2000_v58 = vpop.f32.mrb[43].mxu1 }
 0x7a4   : > { %2013 = vxpose.xlu0.b32.cont [3/4] (short) (narrow) %v2009_v32, 32 }
 0x7a5   : > { %v2003_v20 = vpop.f32.mrb[44].mxu1 }
 0x7a6   : > { %v2010_v7 = vmul.f32 0.17677669, %v2003_v20  ;;  %v2005_v18 = vpop.f32.mrb[45].mxu1 }
 0x7a8   : > { %2014 = vxpose.xlu0.b32.end [4/4] (short) (narrow) %v2010_v7, 32 }
 0x7b2   : > { %v2374_v0 = vpop.xlane.xlu1 %2373 }
 0x7b6   : > { %v2149_v61 = vpop.permute.xlu1 %2148 }
 0x7ba   : > { %v2610_v26 = vpop.permute.xlu1 %2609 }
 0x7d5   : > { %2370 = vadd.xlane.f32.xlu0 %v2369_v40 }
 0x7eb   : > { %2146 = vrot.lane.b32.xlu0 %v4406_v21, %s3437_s28 }
 0x7ef   : > { %2150 = vrot.lane.b32.xlu0 %v4460_v13, %s3437_s28 }
 0x81c   : > { %v2027_v55 = vpop.trf.xlu0 }
 0x81d   : > { %2983 = vmatmul.mubr.msk.f32.vlgmr.msra.gmra.mrb[46].mxu1 %vm380_vm0, %v2027_v55 }
 0x81e   : > { %2125 = vmatprep.mubr.f32.mxu1 %v4773_v49 }
 0x820   : > { %v2028_v38 = vpop.trf.xlu0 }
 0x821   : > { %2984 = vmatmul.mubr.msk.f32.gmra.mrb[48].mxu1 %vm380_vm0, %v2028_v38 }
 0x822   : > { %2131 = vmatprep.mubr.f32.mxu1 %v4773_v49 }
 0x824   : > { %v2029_v50 = vpop.trf.xlu0 }
 0x825   : > { %2985 = vmatmul.mubr.msk.f32.gmra.mrb[50].mxu1 %vm380_vm0, %v2029_v50 }
 0x826   : > { %2137 = vmatprep.mubr.f32.mxu1 %v4773_v49 }
 0x828   : > { %v2030_v41 = vpop.trf.xlu0 }
 0x829   : > { %2986 = vmatmul.mubr.msk.f32.gmra.mrb[52].mxu1 %vm380_vm0, %v2030_v41 }
 0x82a   : > { %2224 = vmatprep.mubr.f32.mxu1 %v4773_v49 }
 0x862   : > { %v2371_v39 = vpop.xlane.xlu0 %2370 }
 0x863   : > { %3362 = vrcp.f32 %v2371_v39 }
 0x864   : > { %3364 = vrcp.f32 %v2374_v0 }
 0x866   : > { %v2147_v59 = vpop.permute.xlu0 %2146 }
 0x86a   : > { %v2151_v52 = vpop.permute.xlu0 %2150 }
 0x86d   : > { %v3363_v10 = vpop.eup %3362 }
 0x86e   : > { %v2383_v6 = vmul.f32 %v3363_v10, %v4601_v54  ;;  %v3365_v11 = vpop.eup %3364  ;;  %v2382_v14 = vmul.f32 %v3363_v10, %v4599_v8 }
 0x86f   : > { %v2386_v5 = vmul.f32 %v3365_v11, %v4568_v29  ;;  %v2385_v36 = vmul.f32 %v3365_v11, %v4566_v3  ;;  %v2757_v3 = vld [vmem:[%s4734_s5 + $0x18] sm:$0xff] }
 0x870   : > { %v2761_v40 = vmul.f32 5.656854, %v2757_v3 }
 0x8f0   : > { %v2121_v21 = vpop.f32.mrb[46].mxu1 }
 0x8f1   : > { %v2123_v13 = vpop.f32.mrb[47].mxu1 }
 0x8f4   : > { %v2127_v9 = vpop.f32.mrb[48].mxu1 }
 0x8f5   : > { %v3080_v15 = vpack.c.bf16 %v2127_v9, %v2121_v21  ;;  %v2129_v43 = vpop.f32.mrb[49].mxu1 }
 0x8f6   : > { %v3078_v1 = vpack.c.bf16 %v2129_v43, %v2123_v13 }
 0x8f8   : > { %v2133_v31 = vpop.f32.mrb[50].mxu1  ;;  %3079 = vmatprep.subr.bf16.mxu1 %v3078_v1 }
 0x8f9   : > { %v2135_v34 = vpop.f32.mrb[51].mxu1  ;;  %3081 = vmatpush1.bf16.msra.mxu1 %v3080_v15 }
 0x8fc   : > { %v2139_v42 = vpop.f32.mrb[52].mxu1 }
 0x8fd   : > { %v3084_v44 = vpack.c.bf16 %v2139_v42, %v2133_v31  ;;  %v2141_v12 = vpop.f32.mrb[53].mxu1 }
 0x8fe   : > { %v3082_v25 = vpack.c.bf16 %v2141_v12, %v2135_v34 }
 0x900   : > { %3083 = vmatprep.subr.bf16.mxu1 %v3082_v25  ;;  %v2612_v25 = vpop.permute.xlu1 %2611 }
 0x901   : > { %3085 = vmatpush1.bf16.msra.mxu1 %v3084_v44 }
 0x902   : > { %3087 = vmatprep.subr.bf16.mxu1 %v4826_v46 }
 0x904   : > { %2987 = vmatmul.mubr.msk.f32.vlgmr.msra.gmra.mrb[30].mxu1 %vm380_vm0, %v2145_v35  ;;  %v2614_v35 = vpop.permute.xlu1 %2613 }
 0x905   : > { %2230 = vmatprep.mubr.f32.mxu1 %v4773_v49 }
 0x908   : > { %2988 = vmatmul.mubr.msk.f32.gmra.mrb[32].mxu1 %vm380_vm0, %v2147_v59  ;;  %v2616_v39 = vpop.permute.xlu1 %2615 }
 0x909   : > { %2236 = vmatprep.mubr.f32.mxu1 %v4773_v49 }
 0x90a   : > { %3089 = vmatpush1.bf16.xpose.msra.mxu1 %v4827_v47 }
 0x90b   : > { %3091 = vmatprep.subr.bf16.mxu1 %v4828_v22 }
 0x90c   : > { %2989 = vmatmul.mubr.msk.f32.gmra.mrb[34].mxu1 %vm380_vm0, %v2149_v61  ;;  %v2729_v46 = vpop.permute.xlu1 %2728 }
 0x90d   : > { %2242 = vmatprep.mubr.f32.mxu1 %v4773_v49 }
 0x910   : > { %2990 = vmatmul.mubr.msk.f32.gmra.mrb[36].mxu1 %vm380_vm0, %v2151_v52  ;;  %v2734_v0 = vpop.permute.xlu1 %2733 }
 0x911   : > { %2451 = vmatprep.mubr.f32.mxu1 %v2377_v30 }
 0x912   : > { %3093 = vmatpush1.bf16.xpose.msra.mxu1 %v4829_v4 }
 0x913   : > { %3095 = vmatprep.subr.bf16.mxu1 %v4830_v24 }
 0x914   : > { %v2739_v4 = vpop.permute.xlu1 %2738 }
 0x919   : > { %2452 = vmatmul.mubr.f32.vlgmr.msra.gmra.mrb[54].mxu1 %v2376_v56 }
 0x91a   : > { %2456 = vmatprep.mubr.f32.mxu1 %v2380_v2  ;;  %3097 = vmatpush1.bf16.msra.mxu1 %v4832_v60 }
 0x91b   : > { %3099 = vmatprep.subr.bf16.mxu1 %v4835_v45 }
 0x91d   : > { %2457 = vmatmul.mubr.f32.gmra.mrb[56].mxu1 %v2379_v51 }
 0x91e   : > { %2461 = vmatprep.mubr.f32.mxu1 %v2383_v6  ;;  %3101 = vmatpush1.bf16.msra.mxu1 %v4838_v19  ;;  %v2744_v6 = vpop.permute.xlu1 %2743 }
 0x921   : > { %2462 = vmatmul.mubr.f32.gmra.mrb[58].mxu1 %v2382_v14 }
 0x922   : > { %2466 = vmatprep.mubr.f32.mxu1 %v2386_v5 }
 0x925   : > { %2467 = vmatmul.mubr.f32.gmra.mrb[60].mxu1 %v2385_v36 }
 0x926   : > { %2584 = vmatprep.mubr.f32.mxu1 %v4773_v49 }
 0x9ec   : > { %v2453_v63 = vpop.f32.mrb[54].mxu1 }
 0x9ed   : > { %v2472_v57 = vmul.f32 0.17677669, %v2453_v63  ;;  %v2455_v32 = vpop.f32.mrb[55].mxu1 }
 0x9ef   : > { %2476 = vxpose.xlu0.b32.start [1/4] (short) (narrow) %v2472_v57, 32 }
 0x9f0   : > { %v2458_v58 = vpop.f32.mrb[56].mxu1 }
 0x9f1   : > { %v2473_v20 = vmul.f32 0.17677669, %v2458_v58  ;;  %v2460_v7 = vpop.f32.mrb[57].mxu1 }
 0x9f3   : > { %2477 = vxpose.xlu0.b32.cont [2/4] (short) (narrow) %v2473_v20, 32 }
 0x9f4   : > { %v2463_v18 = vpop.f32.mrb[58].mxu1 }
 0x9f5   : > { %v2474_v48 = vmul.f32 0.17677669, %v2463_v18  ;;  %v2465_v62 = vpop.f32.mrb[59].mxu1 }
 0x9f7   : > { %2478 = vxpose.xlu0.b32.cont [3/4] (short) (narrow) %v2474_v48, 32 }
 0x9f8   : > { %v2468_v29 = vpop.f32.mrb[60].mxu1 }
 0x9f9   : > { %v2475_v8 = vmul.f32 0.17677669, %v2468_v29  ;;  %v2470_v54 = vpop.f32.mrb[61].mxu1 }
 0x9fb   : > { %2479 = vxpose.xlu0.b32.end [4/4] (short) (narrow) %v2475_v8, 32 }
 0xa24   : > { %2817 = vperm.xlu0 %3184, %v2761_v40  }
 0xa6f   : > { %v2492_v55 = vpop.trf.xlu0 }
 0xa70   : > { %2991 = vmatmul.mubr.msk.f32.vlgmr.msra.gmra.mrb[62].mxu1 %vm380_vm0, %v2492_v55 }
 0xa71   : > { %2590 = vmatprep.mubr.f32.mxu1 %v4773_v49 }
 0xa73   : > { %v2493_v38 = vpop.trf.xlu0 }
 0xa74   : > { %2992 = vmatmul.mubr.msk.f32.gmra.mrb[64].mxu1 %vm380_vm0, %v2493_v38 }
 0xa75   : > { %2596 = vmatprep.mubr.f32.mxu1 %v4773_v49 }
 0xa77   : > { %v2494_v50 = vpop.trf.xlu0 }
 0xa78   : > { %2993 = vmatmul.mubr.msk.f32.gmra.mrb[66].mxu1 %vm380_vm0, %v2494_v50 }
 0xa79   : > { %2602 = vmatprep.mubr.f32.mxu1 %v4773_v49 }
 0xa7b   : > { %v2495_v41 = vpop.trf.xlu0 }
 0xa7c   : > { %2994 = vmatmul.mubr.msk.f32.gmra.mrb[68].mxu1 %vm380_vm0, %v2495_v41 }
 0xa7d   : > { %2689 = vmatprep.mubr.f32.mxu1 %v4773_v49 }
 0xb43   : > { %v2586_v21 = vpop.f32.mrb[62].mxu1 }
 0xb44   : > { %v2588_v13 = vpop.f32.mrb[63].mxu1 }
 0xb47   : > { %v2592_v9 = vpop.f32.mrb[64].mxu1 }
 0xb48   : > { %v3104_v53 = vpack.c.bf16 %v2592_v9, %v2586_v21  ;;  %v2594_v15 = vpop.f32.mrb[65].mxu1  ;;  %v2803_v21 = vpop.permute.xlu1 %2802 }
 0xb49   : > { %v3102_v43 = vpack.c.bf16 %v2594_v15, %v2588_v13 }
 0xb4b   : > { %v2598_v1 = vpop.f32.mrb[66].mxu1  ;;  %3103 = vmatprep.subr.bf16.mxu1 %v3102_v43 }
 0xb4c   : > { %v2600_v31 = vpop.f32.mrb[67].mxu1  ;;  %3105 = vmatpush1.bf16.msra.mxu1 %v3104_v53  ;;  %v2808_v13 = vpop.permute.xlu1 %2807 }
 0xb4f   : > { %v2604_v34 = vpop.f32.mrb[68].mxu1 }
 0xb50   : > { %v3108_v42 = vpack.c.bf16 %v2604_v34, %v2598_v1  ;;  %v2606_v44 = vpop.f32.mrb[69].mxu1  ;;  %v2813_v34 = vpop.permute.xlu1 %2812 }
 0xb51   : > { %v3106_v12 = vpack.c.bf16 %v2606_v44, %v2600_v31 }
 0xb53   : > { %3107 = vmatprep.subr.bf16.mxu1 %v3106_v12 }
 0xb54   : > { %3109 = vmatpush1.bf16.msra.mxu1 %v3108_v42 }
 0xb57   : > { %2995 = vmatmul.mubr.msk.f32.vlgmr.msra.gmra.mrb[30].mxu1 %vm380_vm0, %v2610_v26  ;;  %v2818_v26 = vpop.permute.xlu0 %2817 }
 0xb58   : > { %2695 = vmatprep.mubr.f32.mxu1 %v4773_v49 }
 0xb5b   : > { %2996 = vmatmul.mubr.msk.f32.gmra.mrb[32].mxu1 %vm380_vm0, %v2612_v25 }
 0xb5c   : > { %2701 = vmatprep.mubr.f32.mxu1 %v4773_v49 }
 0xb5f   : > { %2997 = vmatmul.mubr.msk.f32.gmra.mrb[34].mxu1 %vm380_vm0, %v2614_v35 }
 0xb60   : > { %2707 = vmatprep.mubr.f32.mxu1 %v4773_v49 }
 0xb63   : > { %2998 = vmatmul.mubr.msk.f32.gmra.mrb[36].mxu1 %vm380_vm0, %v2616_v39 }
 0xc2a   : > { %v2691_v59 = vpop.f32.mrb[30].mxu1 }
 0xc2b   : > { %v2693_v47 = vpop.f32.mrb[31].mxu1  ;;  %v2746_v61 = vadd.f32 %v2729_v46, %v2691_v59 }
 0xc2c   : > { %v2747_v22 = vadd.f32 %v2729_v46, %v2693_v47 }
 0xc2d   : > { %v2762_v28 = vmul.f32 %v2746_v61, %v2746_v61 }
 0xc2e   : > { %v2697_v27 = vpop.f32.mrb[32].mxu1  ;;  %v2763_v2 = vmul.f32 %v2747_v22, %v2747_v22 }
 0xc2f   : > { %v2748_v52 = vadd.f32 %v2734_v0, %v2697_v27  ;;  %v2699_v30 = vpop.f32.mrb[33].mxu1 }
 0xc30   : > { %v2749_v24 = vadd.f32 %v2734_v0, %v2699_v30 }
 0xc31   : > { %v2764_v56 = vmul.f32 %v2748_v52, %v2748_v52 }
 0xc32   : > { %v2765_v10 = vmul.f32 %v2749_v24, %v2749_v24  ;;  %v2703_v37 = vpop.f32.mrb[34].mxu1 }
 0xc33   : > { %v2770_v49 = vadd.f32 %v2764_v56, %v2762_v28  ;;  %v2750_v60 = vadd.f32 %v2739_v4, %v2703_v37  ;;  %v2705_v16 = vpop.f32.mrb[35].mxu1 }
 0xc34   : > { %v2779_v23 = vadd.f32 %v2765_v10, %v2763_v2  ;;  %v2751_v45 = vadd.f32 %v2739_v4, %v2705_v16 }
 0xc35   : > { %v2766_v51 = vmul.f32 %v2750_v60, %v2750_v60 }
 0xc36   : > { %v2767_v11 = vmul.f32 %v2751_v45, %v2751_v45  ;;  %v2709_v33 = vpop.f32.mrb[36].mxu1 }
 0xc37   : > { %v2771_v17 = vadd.f32 %v2770_v49, %v2766_v51  ;;  %v2752_v19 = vadd.f32 %v2744_v6, %v2709_v33  ;;  %v2711_v14 = vpop.f32.mrb[37].mxu1 }
 0xc38   : > { %v2780_v5 = vadd.f32 %v2779_v23, %v2767_v11  ;;  %v2753_v36 = vadd.f32 %v2744_v6, %v2711_v14 }
 0xc39   : > { %v2768_v63 = vmul.f32 %v2752_v19, %v2752_v19 }
 0xc3a   : > { %v2769_v57 = vmul.f32 %v2753_v36, %v2753_v36 }
 0xc3b   : > { %v2772_v32 = vadd.f32 %v2771_v17, %v2768_v63 }
 0xc3c   : > { %v2781_v58 = vadd.f32 %v2780_v5, %v2769_v57 }
 0xc3d   : > { %v2773_v20 = vrot.slane %v2772_v32, 4 }
 0xc3e   : > { %v2782_v7 = vrot.slane %v2781_v58, 4 }
 0xc3f   : > { %v2774_v18 = vadd.f32 %v2773_v20, %v2772_v32 }
 0xc40   : > { %v2783_v48 = vadd.f32 %v2782_v7, %v2781_v58 }
 0xc41   : > { %v2775_v62 = vrot.slane %v2774_v18, 2 }
 0xc42   : > { %v2784_v29 = vrot.slane %v2783_v48, 2 }
 0xc43   : > { %v2776_v8 = vadd.f32 %v2775_v62, %v2774_v18 }
 0xc44   : > { %v2785_v54 = vadd.f32 %v2784_v29, %v2783_v48 }
 0xc45   : > { %v2777_v3 = vrot.slane %v2776_v8, 1 }
 0xc46   : > { %v2786_v40 = vrot.slane %v2785_v54, 1 }
 0xc47   : > { %v2778_v55 = vadd.f32 %v2777_v3, %v2776_v8 }
 0xc48   : > { %v2787_v38 = vadd.f32 %v2786_v40, %v2785_v54 }
 0xc49   : > { %v2788_v50 = vmax.f32 %v2778_v55, 1e-24 }
 0xc4a   : > { %v2789_v41 = vmax.f32 %v2787_v38, 1e-24 }
 0xc4b   : > { %3366 = vrsqrt.f32 %v2788_v50 }
 0xc4c   : > { %3368 = vrsqrt.f32 %v2789_v41 }
 0xc55   : > { %v3367_v9 = vpop.eup %3366 }
 0xc56   : > { %v3369_v53 = vpop.eup %3368  ;;  %v2798_v15 = vmul.f32 %v3367_v9, %v2752_v19  ;;  %v2792_v43 = vmul.f32 %v3367_v9, %v2746_v61  ;;  %v2794_v1 = vmul.f32 %v3367_v9, %v2748_v52  ;;  %v2796_v31 = vmul.f32 %v3367_v9, %v2750_v60 }
 0xc57   : > { %v2799_v42 = vmul.f32 %v3369_v53, %v2753_v36  ;;  %v2793_v44 = vmul.f32 %v3369_v53, %v2747_v22  ;;  %v2795_v12 = vmul.f32 %v3369_v53, %v2749_v24  ;;  %v2797_v25 = vmul.f32 %v3369_v53, %v2751_v45 }
 0xc58   : > { %v2826_v35 = vmul.f32 %v2818_v26, %v2798_v15  ;;  %v2820_v39 = vmul.f32 %v2803_v21, %v2792_v43  ;;  %v2822_v46 = vmul.f32 %v2808_v13, %v2794_v1  ;;  %v2824_v0 = vmul.f32 %v2813_v34, %v2796_v31 }
 0xc59   : > { %v2827_v59 = vmul.f32 %v2818_v26, %v2799_v42  ;;  %v2821_v47 = vmul.f32 %v2803_v21, %v2793_v44  ;;  %v2823_v61 = vmul.f32 %v2808_v13, %v2795_v12  ;;  %v2825_v22 = vmul.f32 %v2813_v34, %v2797_v25 }
 0xc5a   : > { %2834 = vst [vmem:[%s244_s13 + $0x30] sm:$0xff] %v2826_v35  ;;  %2828 = vst [vmem:[%s244_s13] sm:$0xff] %v2820_v39 }
 0xc5b   : > { %2830 = vst [vmem:[%s244_s13 + $0x10] sm:$0xff] %v2822_v46  ;;  %2832 = vst [vmem:[%s244_s13 + $0x20] sm:$0xff] %v2824_v0 }
 0xc5c   : > { %2835 = vst [vmem:[%s244_s13 + $0x38] sm:$0xff] %v2827_v59  ;;  %2829 = vst [vmem:[%s244_s13 + $0x8] sm:$0xff] %v2821_v47 }
 0xc5d   : > { %2831 = vst [vmem:[%s244_s13 + $0x18] sm:$0xff] %v2823_v61  ;;  %2833 = vst [vmem:[%s244_s13 + $0x28] sm:$0xff] %v2825_v22 }
 0xc5e   : > { %3383 = shalt.err (!%p3380_p3)
}
 0xc5f   : > { %s3384_s29 = scalar_lea.hbm %s4682_s16, 1024  ;;  %s3388_s10 = scalar_lea.hbm %s4735_s6, 2048 }
 0xc60   : > { %p3385_p4 = scmp.ne.s32.totalorder %s4682_s16, %s3384_s29  ;;  %p3389_p9 = scmp.lt.u32.totalorder %s4682_s16, %s4735_s6 }
 0xc61   : > { %p3390_p10 = scmp.lt.u32.totalorder %s3388_s10, %s3384_s29  ;;  %p3392_p12 = scmp.lt.u32.totalorder %s3384_s29, %s4682_s16 }
 0xc62   : > { %p3386_p7 = pnand %p3385_p4, %p3515_p5 }
 0xc63   : > { %p3391_p11 = por %p3390_p10, %p3389_p9 }
 0xc64   : > { %p3387_p8 = pneg %p3386_p7 }
 0xc65   : > { %p3393_p13 = por %p3392_p12, %p3391_p11 }
 0xc67   : > { %p3394_p0 = pnand %p3393_p13, %p3387_p8 }
 0xc69   : > { %3397 = shalt.err (!%p3394_p0)
}
 0xc6a   : > { %s3440_s13 = smov 256   ;;  %s3441_s15 = smov 16  }
 0xc6b   : > { %3138 = dma.vmem_to_hbm [thread:$0]  (%p3515_p5), %s4684_s14, 1024, %s4682_s16, %s4688_s17, %s3440_s13, %s3440_s13, %s3441_s15  }
 0xc6c PF: > { %p3144_p1 = scmp.ge.s32.totalorder %s3432_s24, 2  ;;  %s2865_s25 = sand.u32 1, %s3420_s21  }
 0xc6d   : > { %s2866_s18 = scalar_lea.sflag [#allocation3], %s2865_s25 }
 0xc6e   : > { %p3141_p2 = pnand %p3144_p1, %p3519_p6 }
 0xc70   : > { %3415 = dma.done.wait (!%p3141_p2), %s2866_s18, 1024  }
 0xc71   : > { %3417 = vsyncadd (!%p3141_p2), %s2866_s18, 4294966272  ;;  %p16_p3 = scmp.ge.s32.totalorder %s3502_s27, 4   ;;  %s4839_s21 = smov %s3424_s22 }
 0xc72   : > { %s4840_s22 = smov %s3428_s23  ;;  %s4841_s23 = smov %s3513_s30 }
 0xc73   : > { %s4842_s24 = smov %s3502_s27  ;;  %18 = sbr.rel (!%p16_p3) target bundleno = 3 (0x3), region = 79 }
 0xc7a   :  { %2871 = vsyncpa [#allocation3], 1 }
 0xc7b   :  { %2873 = vsyncpa [#allocation3 + $0x1], 1 }

</bundles_post_ra>
